<compile_context>
chip_gen: v7x
topology: tpu7x:2x2x1
jax: 0.10.0
libtpu: 0.0.40
codegen_flags: <defaults>
</compile_context>

<pallas_src>
import numpy as np
import jax
import jax.numpy as jnp
from jax.experimental import pallas as pl
from jax.experimental.pallas import tpu as pltpu


# ----------------------------------------------------------------------------
# Bilinear (align_corners=False) interpolation matrices, PyTorch semantics.
# ----------------------------------------------------------------------------
def _bilinear_taps(n_out: int, n_in: int):
    scale = n_in / n_out
    src = (np.arange(n_out, dtype=np.float64) + 0.5) * scale - 0.5
    src = np.maximum(src, 0.0)
    i0 = np.minimum(np.floor(src).astype(np.int64), n_in - 1)
    i1 = np.minimum(i0 + 1, n_in - 1)
    w1 = src - i0
    w0 = 1.0 - w1
    return i0, i1, w0, w1


def _bilinear_matrix(n_out: int, n_in: int) -> np.ndarray:
    i0, i1, w0, w1 = _bilinear_taps(n_out, n_in)
    m = np.zeros((n_out, n_in), np.float32)
    for o in range(n_out):
        m[o, i0[o]] += w0[o]
        m[o, i1[o]] += w1[o]
    return m


# ----------------------------------------------------------------------------
# Kernel A: per-batch attention gate.  Layout is channels-on-sublane /
# spatial-on-lane; every matmul is a single dot with a lane-dense N (except the
# small phi conv whose N equals the full g spatial extent).
# ----------------------------------------------------------------------------
def _attn_gate_kernel(xp_ref, g_ref, wth_ref, wph_ref, bph_ref, wps_ref,
                      bps_ref, rphi_ref, ugate_ref, gate_ref):
    cd = wth_ref.dtype      # matmul compute dtype (bf16 in the perf path)

    # theta: 2x2 stride-2 conv as one matmul on the phase-split x (K = 4*Cx).
    theta = jnp.dot(wth_ref[...], xp_ref[0],
                    preferred_element_type=jnp.float32)            # (Cx, St)

    # phi: 1x1 conv on g (K = Cg) + per-channel bias (bias kept f32).
    pg = jnp.dot(wph_ref[...], g_ref[0],
                 preferred_element_type=jnp.float32) + bph_ref[...]  # (Cx, Sg)

    # Bilinear resize (Hg,Wg) -> (Ht,Wt) as ONE lane-dense matmul against the
    # dense Kronecker operator (Sg, St).
    phi_r = jnp.dot(pg.astype(cd), rphi_ref[...],
                    preferred_element_type=jnp.float32)            # (Cx, St)

    # relu + psi (1x1 conv to a single channel) + sigmoid (elementwise in f32).
    f = jnp.maximum(theta + phi_r, 0.0)
    s = jnp.dot(wps_ref[...], f.astype(cd),
                preferred_element_type=jnp.float32) + bps_ref[...]  # (1, St)
    gate_small = jax.nn.sigmoid(s)

    # Bilinear upsample (Ht,Wt) -> (H,W) as one matmul producing a lane-dense
    # (1, H*W) row; the store below is unmasked (H*W is a multiple of 128).
    gate_ref[0] = jnp.dot(gate_small.astype(cd), ugate_ref[...],
                          preferred_element_type=jnp.float32).astype(gate_ref.dtype)


# ----------------------------------------------------------------------------
# Kernel B: full-resolution gating + folded (1x1 conv + BatchNorm).
# grid = (B, spatial_tiles); blocks are (Cx, TILE) with TILE a multiple of 128.
# ----------------------------------------------------------------------------
def _apply_gate_kernel(gate_ref, x_ref, w_ref, b_ref, o_ref):
    # gate: (1,1,T)  x: (1,Cx,T)  w: (Cx,Cx) compute dtype  b: (Cx,1) f32
    y = x_ref[0] * gate_ref[0].astype(jnp.float32)                 # (Cx, T)
    out = jnp.dot(w_ref[...], y.astype(w_ref.dtype),
                  preferred_element_type=jnp.float32) + b_ref[...]
    o_ref[0] = out.astype(o_ref.dtype)


# ----------------------------------------------------------------------------
# Wrapper: parameter folding, layout plumbing, pallas_calls.
# ----------------------------------------------------------------------------
def add_attn_forward(x, g, params, *, spatial_tile=4096,
                     compute_dtype=jnp.bfloat16):
    B, Cx, H, W = x.shape
    Bg, Cg, Hg, Wg = g.shape
    assert B == Bg, "batch sizes of x and g must match"
    Ht, Wt = (H - 2) // 2 + 1, (W - 2) // 2 + 1
    St, Sg, HW = Ht * Wt, Hg * Wg, H * W
    out_dtype = x.dtype
    f32 = jnp.float32

    # ---- parameter folding / layout (cheap one-time XLA work) ----
    w_theta_mat = jnp.transpose(params["w_theta"].astype(f32),
                                (0, 2, 3, 1)).reshape(Cx, 4 * Cx).astype(compute_dtype)
    w_phi_mat = params["w_phi"].reshape(Cx, Cg).astype(compute_dtype)
    b_phi_col = params["b_phi"].reshape(Cx, 1).astype(f32)
    w_psi_row = params["w_psi"].reshape(1, Cx).astype(compute_dtype)
    b_psi_mat = params["b_psi"].reshape(1, 1).astype(f32)

    # Fold inference-mode BatchNorm into the final 1x1 conv.
    # TODO(synk): training-mode BatchNorm (per-batch statistics) not implemented.
    scale = params["bn_gamma"] / jnp.sqrt(params["bn_var"] + params["bn_eps"])
    w_eff = (scale[:, None] * params["w_W"].reshape(Cx, Cx)).astype(compute_dtype)
    b_eff = (scale * (params["b_W"] - params["bn_mean"])
             + params["bn_beta"]).reshape(Cx, 1).astype(f32)

    # Dense Kronecker bilinear operators (PyTorch align_corners=False).
    # TODO(synk): at large spatial extents switch back to separable / per-tile
    # resizes (these dense operators grow quadratically with the image size).
    r_phi_t = jnp.asarray(np.kron(_bilinear_matrix(Ht, Hg),
                                  _bilinear_matrix(Wt, Wg)).T, dtype=compute_dtype)   # (Sg, St)
    u_gate_t = jnp.asarray(np.kron(_bilinear_matrix(H, Ht),
                                   _bilinear_matrix(W, Wt)).T, dtype=compute_dtype)   # (St, HW)

    # Phase-split (pixel-unshuffle) x so theta is a single K=4*Cx matmul; the
    # compute-dtype cast is fused into this one pass over x.
    phases = [x[:, :, di:di + 2 * Ht:2, dj:dj + 2 * Wt:2]
              for di in range(2) for dj in range(2)]
    xp_flat = jnp.concatenate(phases, axis=1).reshape(B, 4 * Cx, St).astype(compute_dtype)
    g_flat = g.reshape(B, Cg, Sg).astype(compute_dtype)
    x_flat = x.reshape(B, Cx, HW)          # kernel B reads x in its native dtype

    # ---- kernel A: attention gate map, one batch element per grid step ----
    gate_flat = pl.pallas_call(
        _attn_gate_kernel,
        out_shape=jax.ShapeDtypeStruct((B, 1, HW), compute_dtype),
        grid_spec=pltpu.PrefetchScalarGridSpec(
            num_scalar_prefetch=0,
            grid=(B,),
            in_specs=[
                pl.BlockSpec((1, 4 * Cx, St), lambda b: (b, 0, 0)),  # phase-split x
                pl.BlockSpec((1, Cg, Sg), lambda b: (b, 0, 0)),      # g
                pl.BlockSpec((Cx, 4 * Cx), lambda b: (0, 0)),        # theta weight
                pl.BlockSpec((Cx, Cg), lambda b: (0, 0)),            # phi weight
                pl.BlockSpec((Cx, 1), lambda b: (0, 0)),             # phi bias (f32)
                pl.BlockSpec((1, Cx), lambda b: (0, 0)),             # psi weight
                pl.BlockSpec((1, 1), lambda b: (0, 0)),              # psi bias (f32)
                pl.BlockSpec((Sg, St), lambda b: (0, 0)),            # dense resize op
                pl.BlockSpec((St, HW), lambda b: (0, 0)),            # dense upsample op
            ],
            out_specs=pl.BlockSpec((1, 1, HW), lambda b: (b, 0, 0)),
        ),
        compiler_params=pltpu.CompilerParams(dimension_semantics=("parallel",)),
    )(xp_flat, g_flat, w_theta_mat, w_phi_mat, b_phi_col, w_psi_row, b_psi_mat,
      r_phi_t, u_gate_t)

    # ---- kernel B: gating + folded 1x1 conv/BN, spatially tiled ----
    # Pick a lane-dense tile that divides H*W when possible (no padding copy).
    cap = (min(spatial_tile, HW) // 128) * 128
    tile = None
    if cap >= 128:
        for t in range(cap, 127, -128):
            if HW % t == 0:
                tile = t
                break
    if tile is None:
        tile = max(cap, 128)
        hw_pad = -(-HW // tile) * tile
        pad = hw_pad - HW
        gate_in = jnp.pad(gate_flat, ((0, 0), (0, 0), (0, pad)))
        x_in = jnp.pad(x_flat, ((0, 0), (0, 0), (0, pad)))
    else:
        hw_pad, gate_in, x_in = HW, gate_flat, x_flat

    out_flat = pl.pallas_call(
        _apply_gate_kernel,
        out_shape=jax.ShapeDtypeStruct((B, Cx, hw_pad), out_dtype),
        grid_spec=pltpu.PrefetchScalarGridSpec(
            num_scalar_prefetch=0,
            grid=(B, hw_pad // tile),
            in_specs=[
                pl.BlockSpec((1, 1, tile), lambda b, t: (b, 0, t)),    # gate
                pl.BlockSpec((1, Cx, tile), lambda b, t: (b, 0, t)),   # x
                pl.BlockSpec((Cx, Cx), lambda b, t: (0, 0)),           # folded conv W
                pl.BlockSpec((Cx, 1), lambda b, t: (0, 0)),            # folded bias
            ],
            out_specs=pl.BlockSpec((1, Cx, tile), lambda b, t: (b, 0, t)),
        ),
        compiler_params=pltpu.CompilerParams(
            dimension_semantics=("parallel", "parallel")),
    )(gate_in, x_in, w_eff, b_eff)

    if hw_pad != HW:
        out_flat = out_flat[:, :, :HW]     # padded tail is bias-only garbage
    return out_flat.reshape(B, Cx, H, W)


# ----------------------------------------------------------------------------
# Pure-JAX reference of the same forward pass (for a correctness check).
# ----------------------------------------------------------------------------
def _reference(x, g, p):
    B, Cx, H, W = x.shape
    Hg, Wg = g.shape[2], g.shape[3]
    dn = ("NCHW", "OIHW", "NCHW")
    theta = jax.lax.conv_general_dilated(x, p["w_theta"], (2, 2), "VALID",
                                         dimension_numbers=dn)
    Ht, Wt = theta.shape[2], theta.shape[3]
    phi = jax.lax.conv_general_dilated(g, p["w_phi"], (1, 1), "VALID",
                                       dimension_numbers=dn)
    phi = phi + p["b_phi"][None, :, None, None]
    rh = jnp.asarray(_bilinear_matrix(Ht, Hg))
    rw = jnp.asarray(_bilinear_matrix(Wt, Wg))
    phi_r = jnp.einsum("oh,pw,bchw->bcop", rh, rw, phi)
    f = jnp.maximum(theta + phi_r, 0.0)
    s = jax.lax.conv_general_dilated(f, p["w_psi"], (1, 1), "VALID",
                                     dimension_numbers=dn)
    s = s + p["b_psi"][None, :, None, None]
    sig = jax.nn.sigmoid(s)
    uh = jnp.asarray(_bilinear_matrix(H, Ht))
    uw = jnp.asarray(_bilinear_matrix(W, Wt))
    gate = jnp.einsum("oh,pw,bchw->bcop", uh, uw, sig)
    y = gate * x
    wy = jax.lax.conv_general_dilated(y, p["w_W"], (1, 1), "VALID",
                                      dimension_numbers=dn)
    wy = wy + p["b_W"][None, :, None, None]
    inv = p["bn_gamma"] / jnp.sqrt(p["bn_var"] + p["bn_eps"])
    return ((wy - p["bn_mean"][None, :, None, None]) * inv[None, :, None, None]
            + p["bn_beta"][None, :, None, None])


if __name__ == "__main__":
    key = jax.random.PRNGKey(0)
    ks = jax.random.split(key, 12)

    B, Cx, Cg = 2, 64, 256           # module defaults: g_channels=256
    H = W = 32                       # x spatial; theta_x -> 16x16
    Hg = Wg = 8                      # g spatial (resized up to 16x16 inside)

    x = jax.random.normal(ks[0], (B, Cx, H, W), jnp.float32)
    g = jax.random.normal(ks[1], (B, Cg, Hg, Wg), jnp.float32)

    params = dict(
        w_theta=jax.random.normal(ks[2], (Cx, Cx, 2, 2), jnp.float32) * 0.05,
        w_phi=jax.random.normal(ks[3], (Cx, Cg, 1, 1), jnp.float32) * 0.05,
        b_phi=jax.random.normal(ks[4], (Cx,), jnp.float32) * 0.1,
        w_psi=jax.random.normal(ks[5], (1, Cx, 1, 1), jnp.float32) * 0.05,
        b_psi=jax.random.normal(ks[6], (1,), jnp.float32) * 0.1,
        w_W=jax.random.normal(ks[7], (Cx, Cx, 1, 1), jnp.float32) * 0.05,
        b_W=jax.random.normal(ks[8], (Cx,), jnp.float32) * 0.1,
        bn_gamma=1.0 + 0.1 * jax.random.normal(ks[9], (Cx,), jnp.float32),
        bn_beta=0.1 * jax.random.normal(ks[10], (Cx,), jnp.float32),
        bn_mean=0.1 * jax.random.normal(ks[11], (Cx,), jnp.float32),
        bn_var=jnp.full((Cx,), 0.8, jnp.float32),
        bn_eps=1e-5,
    )

    y_ref = _reference(x, g, params)

    # Tight correctness check with f32 matmuls.
    y32 = jax.block_until_ready(
        add_attn_forward(x, g, params, compute_dtype=jnp.float32))
    assert y32.shape == (B, Cx, H, W), y32.shape
    err32 = float(jnp.max(jnp.abs(y32 - y_ref)))
    assert err32 < 2e-3, f"f32 path mismatch vs reference, max abs err = {err32}"

    # Performance path: bf16 matmul operands, f32 accumulation (looser tolerance).
    ybf = jax.block_until_ready(
        add_attn_forward(x, g, params, compute_dtype=jnp.bfloat16))
    errbf = float(jnp.max(jnp.abs(ybf.astype(jnp.float32) - y_ref)))
    assert errbf < 8e-2, f"bf16 path mismatch vs reference, max abs err = {errbf}"

    print("KERNEL_OK")
</pallas_src>

<mosaic_0001>
module attributes {stable_mosaic.version = 11 : i64} {
  func.func @_attn_gate_kernel(%arg0: i32, %arg1: memref<1x256x256xf32, #tpu.memory_space<vmem>>, %arg2: memref<1x256x64xf32, #tpu.memory_space<vmem>>, %arg3: memref<64x256xf32, #tpu.memory_space<vmem>>, %arg4: memref<64x256xf32, #tpu.memory_space<vmem>>, %arg5: memref<64x1xf32, #tpu.memory_space<vmem>>, %arg6: memref<1x64xf32, #tpu.memory_space<vmem>>, %arg7: memref<1x1xf32, #tpu.memory_space<vmem>>, %arg8: memref<64x256xf32, #tpu.memory_space<vmem>>, %arg9: memref<256x1024xf32, #tpu.memory_space<vmem>>, %arg10: memref<1x1x1024xf32, #tpu.memory_space<vmem>>) attributes {dimension_semantics = [#tpu.dimension_semantics<parallel>], iteration_bounds = array<i64: 2>, scalar_prefetch = 0 : i64, scratch_operands = 0 : i64, tpu.core_type = #tpu.core_type<tc>, window_params = [{transform_indices = @transform_0, window_bounds = array<i64: 1, 256, 256>}, {transform_indices = @transform_1, window_bounds = array<i64: 1, 256, 64>}, {pipeline_mode = #tpu.pipeline_mode<synchronous>, transform_indices = @transform_2, window_bounds = array<i64: 64, 256>}, {pipeline_mode = #tpu.pipeline_mode<synchronous>, transform_indices = @transform_3, window_bounds = array<i64: 64, 256>}, {pipeline_mode = #tpu.pipeline_mode<synchronous>, transform_indices = @transform_4, window_bounds = array<i64: 64, 1>}, {pipeline_mode = #tpu.pipeline_mode<synchronous>, transform_indices = @transform_5, window_bounds = array<i64: 1, 64>}, {pipeline_mode = #tpu.pipeline_mode<synchronous>, transform_indices = @transform_6, window_bounds = array<i64: 1, 1>}, {pipeline_mode = #tpu.pipeline_mode<synchronous>, transform_indices = @transform_7, window_bounds = array<i64: 64, 256>}, {pipeline_mode = #tpu.pipeline_mode<synchronous>, transform_indices = @transform_8, window_bounds = array<i64: 256, 1024>}, {transform_indices = @transform_9, window_bounds = array<i64: 1, 1, 1024>}]} {
    %c0 = arith.constant 0 : index
    %c0_0 = arith.constant 0 : index
    %0 = vector.load %arg3[%c0, %c0_0] : memref<64x256xf32, #tpu.memory_space<vmem>>, vector<64x256xf32>
    %c0_1 = arith.constant 0 : index
    %c0_2 = arith.constant 0 : index
    %c0_3 = arith.constant 0 : index
    %1 = vector.load %arg1[%c0_1, %c0_2, %c0_3] : memref<1x256x256xf32, #tpu.memory_space<vmem>>, vector<1x256x256xf32>
    %2 = vector.shape_cast %1 : vector<1x256x256xf32> to vector<256x256xf32>
    %cst = arith.constant dense<0.000000e+00> : vector<64x256xf32>
    %3 = tpu.matmul %0, %2, %cst {dimension_numbers = #tpu.dot_dimension_numbers<[1], [0], [0], [1], [0, 0, 1, 1], [], []>} : vector<64x256xf32>, vector<256x256xf32>, vector<64x256xf32> -> vector<64x256xf32>
    %c0_4 = arith.constant 0 : index
    %c0_5 = arith.constant 0 : index
    %4 = vector.load %arg4[%c0_4, %c0_5] : memref<64x256xf32, #tpu.memory_space<vmem>>, vector<64x256xf32>
    %c0_6 = arith.constant 0 : index
    %c0_7 = arith.constant 0 : index
    %c0_8 = arith.constant 0 : index
    %5 = vector.load %arg2[%c0_6, %c0_7, %c0_8] : memref<1x256x64xf32, #tpu.memory_space<vmem>>, vector<1x256x64xf32>
    %6 = vector.shape_cast %5 : vector<1x256x64xf32> to vector<256x64xf32>
    %cst_9 = arith.constant dense<0.000000e+00> : vector<64x64xf32>
    %7 = tpu.matmul %4, %6, %cst_9 {dimension_numbers = #tpu.dot_dimension_numbers<[1], [0], [0], [1], [0, 0, 1, 1], [], []>} : vector<64x256xf32>, vector<256x64xf32>, vector<64x64xf32> -> vector<64x64xf32>
    %c0_10 = arith.constant 0 : index
    %c0_11 = arith.constant 0 : index
    %8 = vector.load %arg5[%c0_10, %c0_11] : memref<64x1xf32, #tpu.memory_space<vmem>>, vector<64x1xf32>
    %9 = vector.broadcast %8 : vector<64x1xf32> to vector<64x64xf32>
    %10 = arith.addf %7, %9 : vector<64x64xf32>
    %c0_12 = arith.constant 0 : index
    %c0_13 = arith.constant 0 : index
    %11 = vector.load %arg8[%c0_12, %c0_13] : memref<64x256xf32, #tpu.memory_space<vmem>>, vector<64x256xf32>
    %cst_14 = arith.constant dense<0.000000e+00> : vector<64x256xf32>
    %12 = tpu.matmul %10, %11, %cst_14 {dimension_numbers = #tpu.dot_dimension_numbers<[1], [0], [0], [1], [0, 0, 1, 1], [], []>} : vector<64x64xf32>, vector<64x256xf32>, vector<64x256xf32> -> vector<64x256xf32>
    %13 = arith.addf %3, %12 : vector<64x256xf32>
    %cst_15 = arith.constant 0.000000e+00 : f32
    %14 = vector.broadcast %cst_15 : f32 to vector<64x256xf32>
    %15 = arith.maximumf %13, %14 : vector<64x256xf32>
    %c0_16 = arith.constant 0 : index
    %c0_17 = arith.constant 0 : index
    %16 = vector.load %arg6[%c0_16, %c0_17] : memref<1x64xf32, #tpu.memory_space<vmem>>, vector<1x64xf32>
    %cst_18 = arith.constant dense<0.000000e+00> : vector<1x256xf32>
    %17 = tpu.matmul %16, %15, %cst_18 {dimension_numbers = #tpu.dot_dimension_numbers<[1], [0], [0], [1], [0, 0, 1, 1], [], []>} : vector<1x64xf32>, vector<64x256xf32>, vector<1x256xf32> -> vector<1x256xf32>
    %c0_19 = arith.constant 0 : index
    %c0_20 = arith.constant 0 : index
    %18 = vector.load %arg7[%c0_19, %c0_20] : memref<1x1xf32, #tpu.memory_space<vmem>>, vector<1x1xf32>
    %19 = vector.broadcast %18 : vector<1x1xf32> to vector<1x256xf32>
    %20 = arith.addf %17, %19 : vector<1x256xf32>
    %21 = arith.negf %20 : vector<1x256xf32>
    %22 = math.exp %21 : vector<1x256xf32>
    %cst_21 = arith.constant 1.000000e+00 : f32
    %23 = vector.broadcast %cst_21 : f32 to vector<1x256xf32>
    %24 = arith.addf %23, %22 : vector<1x256xf32>
    %25 = arith.divf %23, %24 : vector<1x256xf32>
    %c0_22 = arith.constant 0 : index
    %c0_23 = arith.constant 0 : index
    %26 = vector.load %arg9[%c0_22, %c0_23] : memref<256x1024xf32, #tpu.memory_space<vmem>>, vector<256x1024xf32>
    %cst_24 = arith.constant dense<0.000000e+00> : vector<1x1024xf32>
    %27 = tpu.matmul %25, %26, %cst_24 {dimension_numbers = #tpu.dot_dimension_numbers<[1], [0], [0], [1], [0, 0, 1, 1], [], []>} : vector<1x256xf32>, vector<256x1024xf32>, vector<1x1024xf32> -> vector<1x1024xf32>
    %c0_25 = arith.constant 0 : index
    %c0_26 = arith.constant 0 : index
    %c0_27 = arith.constant 0 : index
    %28 = vector.load %arg10[%c0_25, %c0_26, %c0_27] : memref<1x1x1024xf32, #tpu.memory_space<vmem>>, vector<1x1x1024xf32>
    %29 = vector.shape_cast %28 : vector<1x1x1024xf32> to vector<1x1024xf32>
    %30 = vector.shape_cast %27 : vector<1x1024xf32> to vector<1x1x1024xf32>
    tpu.vector_store %arg10[%c0_25, %c0_26, %c0_27], %30 {strides = array<i32>} : memref<1x1x1024xf32, #tpu.memory_space<vmem>>, vector<1x1x1024xf32>,
    return
  }
  func.func @transform_0(%arg0: i32) -> (i32, i32, i32) {
    %c0_i32 = arith.constant 0 : i32
    %c0_i32_0 = arith.constant 0 : i32
    %c0_i32_1 = arith.constant 0 : i32
    return %arg0, %c0_i32, %c0_i32_0 : i32, i32, i32
  }
  func.func @transform_1(%arg0: i32) -> (i32, i32, i32) {
    %c0_i32 = arith.constant 0 : i32
    %c0_i32_0 = arith.constant 0 : i32
    %c0_i32_1 = arith.constant 0 : i32
    return %arg0, %c0_i32, %c0_i32_0 : i32, i32, i32
  }
  func.func @transform_2(%arg0: i32) -> (i32, i32) {
    %c0_i32 = arith.constant 0 : i32
    %c0_i32_0 = arith.constant 0 : i32
    %c0_i32_1 = arith.constant 0 : i32
    return %c0_i32, %c0_i32_0 : i32, i32
  }
  func.func @transform_3(%arg0: i32) -> (i32, i32) {
    %c0_i32 = arith.constant 0 : i32
    %c0_i32_0 = arith.constant 0 : i32
    %c0_i32_1 = arith.constant 0 : i32
    return %c0_i32, %c0_i32_0 : i32, i32
  }
  func.func @transform_4(%arg0: i32) -> (i32, i32) {
    %c0_i32 = arith.constant 0 : i32
    %c0_i32_0 = arith.constant 0 : i32
    %c0_i32_1 = arith.constant 0 : i32
    return %c0_i32, %c0_i32_0 : i32, i32
  }
  func.func @transform_5(%arg0: i32) -> (i32, i32) {
    %c0_i32 = arith.constant 0 : i32
    %c0_i32_0 = arith.constant 0 : i32
    %c0_i32_1 = arith.constant 0 : i32
    return %c0_i32, %c0_i32_0 : i32, i32
  }
  func.func @transform_6(%arg0: i32) -> (i32, i32) {
    %c0_i32 = arith.constant 0 : i32
    %c0_i32_0 = arith.constant 0 : i32
    %c0_i32_1 = arith.constant 0 : i32
    return %c0_i32, %c0_i32_0 : i32, i32
  }
  func.func @transform_7(%arg0: i32) -> (i32, i32) {
    %c0_i32 = arith.constant 0 : i32
    %c0_i32_0 = arith.constant 0 : i32
    %c0_i32_1 = arith.constant 0 : i32
    return %c0_i32, %c0_i32_0 : i32, i32
  }
  func.func @transform_8(%arg0: i32) -> (i32, i32) {
    %c0_i32 = arith.constant 0 : i32
    %c0_i32_0 = arith.constant 0 : i32
    %c0_i32_1 = arith.constant 0 : i32
    return %c0_i32, %c0_i32_0 : i32, i32
  }
  func.func @transform_9(%arg0: i32) -> (i32, i32, i32) {
    %c0_i32 = arith.constant 0 : i32
    %c0_i32_0 = arith.constant 0 : i32
    %c0_i32_1 = arith.constant 0 : i32
    return %arg0, %c0_i32, %c0_i32_0 : i32, i32, i32
  }
}

</mosaic_0001>

<bundles_post_ra>
// kernel: tpu_custom_call.1
= control target key start
LH: loop header
LB: loop body
LE: loop exit
PB: predicated region body
PF: predicated region fallthrough
CT: control target
= control target key end

     0   :  { %s3014_s0 = inlined_call_operand.hbm [shape: f32[2,256,256], index: 0, kind: input, shape index: {}]   ;;  %s3015_s1 = inlined_call_operand.vmem [shape: f32[2,256,64], index: 1, kind: input, shape index: {}]   ;;  %s3016_s2 = inlined_call_operand.vmem [shape: f32[64,256], index: 2, kind: input, shape index: {}]   ;;  %s3017_s3 = inlined_call_operand.vmem [shape: f32[64,256], index: 3, kind: input, shape index: {}]   ;;  %s3018_s4 = inlined_call_operand.vmem [shape: f32[64,1], index: 4, kind: input, shape index: {}]   ;;  %s3019_s5 = inlined_call_operand.vmem [shape: f32[1,64], index: 5, kind: input, shape index: {}]   ;;  %s3020_s6 = inlined_call_operand.<no memory space> [shape: f32[1,1], index: 6, kind: input, shape index: {}]   ;;  %s3021_s7 = inlined_call_operand.vmem [shape: f32[64,256], index: 7, kind: input, shape index: {}]   ;;  %s3022_s8 = inlined_call_operand.hbm [shape: f32[256,1024], index: 8, kind: input, shape index: {}]   ;;  %s3023_s9 = inlined_call_operand.hbm [shape: f32[2,1,1024], index: 9, kind: output, shape index: {}]  }
   0x1   :  { %v14_v0 = vstv %s3020_s6 }
   0x2   :  { %15 = vst [vmem:[#allocation2] sm:$0x1] %v14_v0 }
   0x3   :  { %16 = vsyncpa [#allocation4], 0 }
   0x4   :  { %18 = vsyncpa [#allocation4 + $0x1], 0 }
   0x5   :  { %19 = vsyncpa [#allocation7], 0 }
   0x6   :  { %20 = vsyncpa [#allocation5], 0 }
   0x7   :  { %22 = vsyncpa [#allocation5 + $0x1], 0  ;;  %s2510_s11 = smov 0   ;;  %s2512_s12 = smov 0  }
   0x8   :  { %s2514_s13 = smov 0   ;;  %s2516_s14 = smov 0  }
   0x9 LB: > { %s2531_s6 = sadd.s32 4294967295, %s2445_s14   ;;  %s1755_s15 = sadd.s32 4294967294, %s2445_s14   ;;  %s2445_s14 = sphi %s2516_s14, %s3043_s14   ;;  %s2441_s13 = sphi %s2514_s13, %s3046_s13   ;;  %s2437_s12 = sphi %s2512_s12, %s3045_s12   ;;  %s2433_s11 = sphi %s2510_s11, %s3044_s11  }
   0xa   : > { %p48_p0 = scmp.ne.s32.totalorder %s2437_s12, %s2433_s11  ;;  %p3024_p1 = scmp.eq.s32.totalorder %s2531_s6, 0 }
   0xb   : > { %p251_p3 = scmp.eq.s32.totalorder %s1755_s15, 1  ;;  %p1756_p5 = scmp.ge.s32.totalorder %s2445_s14, 1 }
   0xc   : > { %p2540_p4 = por %p3024_p1, %p48_p0  ;;  %p258_p7 = scmp.lt.s32.totalorder %s2445_s14, 3 }
   0xd   : > { %p2545_p6 = por %p251_p3, %p48_p0  ;;  %s2447_s19 = smov [#allocation6]  }
   0xe   : > { %s3029_s16 = scalar_select %p2540_p4, 1, 0 }
   0xf   : > { %s3030_s17 = scalar_select %p2545_p6, 1, 0 }
  0x10   : > { %p2550_p8 = pnand %p1756_p5, %p258_p7  ;;  %s288_s20 = sshll.u32 %s2447_s19, 4  ;;  %s2554_s20 = int_to_ptr.vmem [resolvable:$true] %s288_s20 }
  0x11   : > { %s2566_s22 = sadd.s32 1, %s2445_s14   ;;  %s35_s23 = sadd.s32 1, %s2441_s13 }
  0x12   : > { %s3031_s18 = scalar_select %p2550_p8, 1, 0 }
  0x13   : > { %p2251_p9 = pneg %p2550_p8  ;;  %3033 = sst [smem:[#allocation12_spill]] %s2566_s22 }
  0x14   : > { %s32_s24 = ssub.s32 %s2445_s14, %s2566_s22  ;;  %s2317_s27 = scalar_lea.hbm %s3022_s8, 32768 }
  0x15   : > { %p2561_p11 = pnand %p2251_p9, %p3024_p1  ;;  %p2318_p12 = scmp.ne.s32.totalorder %s3022_s8, %s2317_s27 }
  0x16   : > { %p2324_p5 = scmp.lt.u32.totalorder %s2317_s27, %s3022_s8 }
  0x17   : > { %p2319_p13 = pneg %p2561_p11 }
  0x19   : > { %p2320_p0 = pnand %p2319_p13, %p2318_p12 }
  0x1b   : > { %p2321_p3 = pneg %p2320_p0 }
  0x1d   : > { %p2326_p7 = pnand %p2324_p5, %p2321_p3 }
  0x1f   : > { %2329 = shalt.err (!%p2326_p7)
}
  0x20   : > { %s2330_s15 = scalar_lea.vmem %s2554_s20, 32768  ;;  %p2338_p2 = scmp.lt.s32.totalorder %s2554_s20, %s2554_s20 }
  0x21   : > { %p2331_p9 = scmp.ne.s32.totalorder %s2554_s20, %s2330_s15  ;;  %p2339_p6 = scmp.lt.s32.totalorder %s2330_s15, %s2330_s15 }
  0x23   : > { %p2333_p10 = pnand %p2331_p9, %p2319_p13  ;;  %p2340_p4 = por %p2339_p6, %p2338_p2 }
  0x25   : > { %p2334_p1 = pneg %p2333_p10 }
  0x27   : > { %p2341_p8 = pnand %p2340_p4, %p2334_p1 }
  0x29   : > { %2344 = shalt.err (!%p2341_p8)
}
  0x2a   : > { %s2448_s19 = smov 1024   ;;  %s2449_s25 = smov 64  }
  0x2b   : > { %2254 = dma.hbm_to_vmem [thread:$0]  (!%p2561_p11), %s3022_s8, 32768, %s2554_s20, [#allocation7], %s2448_s19, %s2448_s19, %s2449_s25  }
  0x2c   : > { %p33_p2 = scmp.eq.s32.totalorder %s32_s24, 0  ;;  %p42_p1 = scmp.ne.s32.totalorder %s2441_s13, %s2437_s12 }
  0x2d   : > { %p43_p4 = scmp.eq.s32.totalorder %s2445_s14, 0  ;;  %p2264_p6 = scmp.lt.s32.totalorder %s2445_s14, 2 }
  0x2e   : > { %s2597_s28 = scalar_select %p33_p2, %s2441_s13, %s35_s23  }
  0x2f   : > { %p44_p8 = por %p43_p4, %p42_p1  ;;  %p3034_p10 = scmp.eq.s32.totalorder %s2531_s6, 1 }
  0x30   : > { %s302_s30 = sand.u32 1, %s2441_s13   ;;  %s1784_s10 = sshll.u32 %s2445_s14, 13 }
  0x31   : > { %p2601_p12 = por %p3034_p10, %p42_p1  ;;  %s1759_s15 = sshll.u32 %s302_s30, 9 }
  0x32   : > { %s2610_s26 = scalar_lea.hbm %s3014_s0, %s1784_s10  ;;  %s306_s20 = scalar_lea.vmem [#allocation3], %s1759_s15 }
  0x33   : > { %s313_s23 = sshll.u32 %s306_s20, 4  ;;  %p2612_p11 = pnand %p2264_p6, %p44_p8  ;;  %s2616_s23 = int_to_ptr.vmem [resolvable:$true] %s313_s23 }
  0x34   : > { %s2618_s19 = scalar_lea.sflag [#allocation4], %s302_s30  ;;  %s2345_s25 = scalar_lea.hbm %s2610_s26, 8192 }
  0x35   : > { %p2346_p13 = scmp.ne.s32.totalorder %s2610_s26, %s2345_s25  ;;  %p2347_p0 = pneg %p2612_p11 }
  0x36   : > { %s2350_s10 = scalar_lea.hbm %s3014_s0, 16384  ;;  %p2351_p7 = scmp.lt.u32.totalorder %s2610_s26, %s3014_s0 }
  0x37   : > { %p2348_p3 = pnand %p2347_p0, %p2346_p13  ;;  %p2352_p9 = scmp.lt.u32.totalorder %s2350_s10, %s2345_s25 }
  0x38   : > { %p2354_p1 = scmp.lt.u32.totalorder %s2345_s25, %s2610_s26 }
  0x39   : > { %p2349_p5 = pneg %p2348_p3  ;;  %p2353_p2 = por %p2352_p9, %p2351_p7 }
  0x3b   : > { %p2355_p4 = por %p2354_p1, %p2353_p2 }
  0x3d   : > { %p2356_p6 = pnand %p2355_p4, %p2349_p5 }
  0x3f   : > { %2359 = shalt.err (!%p2356_p6)
}
  0x40   : > { %s2360_s30 = scalar_lea.vmem %s2616_s23, 8192  ;;  %s2450_s20 = smov [#allocation3]  }
  0x41   : > { %p2361_p8 = scmp.ne.s32.totalorder %s2616_s23, %s2360_s30  ;;  %s2365_s22 = sshll.u32 %s2450_s20, 4  ;;  %s2366_s22 = int_to_ptr.vmem [resolvable:$false] %s2365_s22 }
  0x42   : > { %s2367_s27 = scalar_lea.vmem %s2366_s22, 16384  ;;  %p2368_p3 = scmp.lt.s32.totalorder %s2616_s23, %s2366_s22 }
  0x43   : > { %p2363_p10 = pnand %p2361_p8, %p2347_p0  ;;  %p2369_p7 = scmp.lt.s32.totalorder %s2367_s27, %s2360_s30 }
  0x45   : > { %p2364_p13 = pneg %p2363_p10  ;;  %p2370_p9 = por %p2369_p7, %p2368_p3 }
  0x47   : > { %p2371_p2 = pnand %p2370_p9, %p2364_p13 }
  0x49   : > { %2374 = shalt.err (!%p2371_p2)
}
  0x4a   : > { %s2451_s25 = smov 256   ;;  %s2452_s10 = smov 16  }
  0x4b   : > { %2258 = dma.hbm_to_vmem [thread:$0]  (!%p2612_p11), %s2610_s26, 8192, %s2616_s23, %s2618_s19, %s2451_s25, %s2451_s25, %s2452_s10  }
  0x4c   : > { %p3037_p0 = scmp.ne.s32.totalorder %s3031_s18, 0 }
  0x4d   : > { %s2649_s15 = sand.u32 (!%p3037_p0), 1, %s2437_s12   ;;  %p3038_p5 = scmp.ne.s32.totalorder (!%p3037_p0), %s3029_s16, 0 }
  0x4e   : > { %333 = sbr.rel (%p3037_p0) target bundleno = 1203 (0x4b3), region = 56  ;;  %s1763_s21 = sshll.u32 (!%p3037_p0), %s2649_s15, 9 }
  0x4f   : > { %s336_s30 = scalar_lea.sflag (!%p3037_p0), [#allocation4], %s2649_s15  ;;  %s2653_s20 = scalar_lea.vmem (!%p3037_p0), [#allocation3], %s1763_s21 }
  0x55   : > { %2420 = dma.done.wait (%p3038_p5), %s336_s30, 8192  }
  0x56   : > { %2422 = vsyncadd (%p3038_p5), %s336_s30, 4294959104  ;;  %p3039_p11 = scmp.eq.s32.totalorder %s2531_s6, 0 }
  0x58   : > { %2424 = dma.done.wait (%p3039_p11), [#allocation7], 32768   ;;  %p3040_p1 = pmov %p3039_p11 }
  0x59   : > { %p383_p4 = scmp.lt.s32.totalorder %s2531_s6, 1  ;;  %v2453_v1 = vmov 0   ;;  %v469_v27 = vld [vmem:[%s3017_s3 + $0x8] sm:$0xff]  ;;  %v516_v36 = vld [vmem:[%s3018_s4] sm:$0xff]  ;;  %v518_v40 = vld [vmem:[%s3018_s4 + $0x10] sm:$0xff]  ;;  %vm685_vm0 = vcmask 523264  }
  0x5a   : > { %2426 = vsyncadd (%p3040_p1), [#allocation7], 4294934528  ;;  %2307 = vset.pattern.permute.xlu0 %v2453_v1  ;;  %2308 = vset.pattern.permute.xlu1 %v2453_v1  ;;  %v517_v42 = vld [vmem:[%s3018_s4 + $0x8] sm:$0xff]  ;;  %v519_v43 = vld [vmem:[%s3018_s4 + $0x18] sm:$0xff]  ;;  %s1649_s22 = scalar_lea.sflag [#allocation5], %s2649_s15 }
  0x5b   : > { %s384_s18 = scalar_select %p383_p4, %s2531_s6, 1  ;;  %628 = vmatprep.mubr.f32.mxu0 %v469_v27  ;;  %526 = vperm.xlu0 %2307, %v516_v36   ;;  %v670_v45 = vld [vmem:[%s3021_s7 + $0x8] sm:$0xff]  ;;  %v672_v46 = vld [vmem:[%s3021_s7 + $0x18] sm:$0xff]  ;;  %v669_v47 = vld [vmem:[%s3021_s7] sm:$0xff] }
  0x5c   : > { %536 = vperm.xlu1 %2308, %v518_v40   ;;  %v1875_v49 = vpack.c.bf16 %v672_v46, %v670_v45  ;;  %v671_v50 = vld [vmem:[%s3021_s7 + $0x10] sm:$0xff]  ;;  %v674_v51 = vld [vmem:[%s3021_s7 + $0x28] sm:$0xff]  ;;  %v676_v52 = vld [vmem:[%s3021_s7 + $0x38] sm:$0xff] }
  0x5d   : > { %s1785_s26 = sshll.u32 %s384_s18, 8  ;;  %v1877_v55 = vpack.c.bf16 %v671_v50, %v669_v47  ;;  %v1879_v56 = vpack.c.bf16 %v676_v52, %v674_v51  ;;  %v673_v57 = vld [vmem:[%s3021_s7 + $0x20] sm:$0xff]  ;;  %v675_v58 = vld [vmem:[%s3021_s7 + $0x30] sm:$0xff]  ;;  %v521_v62 = vld [vmem:[%s3018_s4 + $0x28] sm:$0xff]  ;;  %s1765_s18 = sshll.u32 %s2649_s15, 3 }
  0x5e   : > { %s2668_s19 = scalar_lea.vmem %s3015_s1, %s1785_s26  ;;  %v520_v61 = vld [vmem:[%s3018_s4 + $0x20] sm:$0xff]  ;;  %1876 = vmatprep.subr.bf16.mxu1 %v1875_v49  ;;  %v1881_v63 = vpack.c.bf16 %v675_v58, %v673_v57  ;;  %v678_v1 = vld [vmem:[%s3021_s7 + $0x48] sm:$0xff]  ;;  %v483_v27 = vld [vmem:[%s3017_s3 + $0x78] sm:$0xff]  ;;  %s382_s26 = scalar_lea.vmem [#allocation8], %s1765_s18 }
  0x5f   : > { %v500_v2 = vld [vmem:[%s2668_s19 + $0x80] sm:$0xff]  ;;  %v501_v3 = vld [vmem:[%s2668_s19 + $0x88] sm:$0xff]  ;;  %v502_v7 = vld [vmem:[%s2668_s19 + $0x90] sm:$0xff]  ;;  %531 = vperm.xlu0 %2307, %v517_v42   ;;  %1878 = vmatpush1.bf16.msra.mxu1 %v1877_v55 }
  0x60   : > { %v484_v4 = vld [vmem:[%s2668_s19] sm:$0xff]  ;;  %v1843_v5 = vpack.c.bf16 %v501_v3, %v500_v2  ;;  %v485_v6 = vld [vmem:[%s2668_s19 + $0x8] sm:$0xff]  ;;  %v503_v8 = vld [vmem:[%s2668_s19 + $0x98] sm:$0xff]  ;;  %541 = vperm.xlu1 %2308, %v519_v43   ;;  %1880 = vmatprep.subr.bf16.mxu1 %v1879_v56 }
  0x61   : > { %v1845_v9 = vpack.c.bf16 %v485_v6, %v484_v4  ;;  %v1847_v10 = vpack.c.bf16 %v503_v8, %v502_v7  ;;  %v486_v11 = vld [vmem:[%s2668_s19 + $0x10] sm:$0xff]  ;;  %v487_v12 = vld [vmem:[%s2668_s19 + $0x18] sm:$0xff]  ;;  %v504_v13 = vld [vmem:[%s2668_s19 + $0xa0] sm:$0xff] }
  0x62   : > { %1844 = vmatprep.subr.bf16.mxu0 %v1843_v5  ;;  %v505_v14 = vld [vmem:[%s2668_s19 + $0xa8] sm:$0xff]  ;;  %v1849_v15 = vpack.c.bf16 %v487_v12, %v486_v11  ;;  %v488_v17 = vld [vmem:[%s2668_s19 + $0x20] sm:$0xff]  ;;  %v506_v19 = vld [vmem:[%s2668_s19 + $0xb0] sm:$0xff] }
  0x63   : > { %1846 = vmatpush3.bf16.msra.mxu0 %v1845_v9  ;;  %v1851_v16 = vpack.c.bf16 %v505_v14, %v504_v13  ;;  %v489_v18 = vld [vmem:[%s2668_s19 + $0x28] sm:$0xff]  ;;  %v507_v20 = vld [vmem:[%s2668_s19 + $0xb8] sm:$0xff]  ;;  %v490_v23 = vld [vmem:[%s2668_s19 + $0x30] sm:$0xff]  ;;  %546 = vperm.xlu0 %2307, %v520_v61  }
  0x64   : > { %1848 = vmatprep.subr.bf16.mxu0 %v1847_v10  ;;  %v1853_v21 = vpack.c.bf16 %v489_v18, %v488_v17  ;;  %v1855_v22 = vpack.c.bf16 %v507_v20, %v506_v19  ;;  %v491_v24 = vld [vmem:[%s2668_s19 + $0x38] sm:$0xff]  ;;  %v508_v25 = vld [vmem:[%s2668_s19 + $0xc0] sm:$0xff]  ;;  %v509_v26 = vld [vmem:[%s2668_s19 + $0xc8] sm:$0xff]  ;;  %551 = vperm.xlu1 %2308, %v521_v62  }
  0x65   : > { %v1857_v28 = vpack.c.bf16 %v491_v24, %v490_v23  ;;  %v1859_v29 = vpack.c.bf16 %v509_v26, %v508_v25  ;;  %v492_v30 = vld [vmem:[%s2668_s19 + $0x40] sm:$0xff]  ;;  %v493_v31 = vld [vmem:[%s2668_s19 + $0x48] sm:$0xff]  ;;  %v510_v32 = vld [vmem:[%s2668_s19 + $0xd0] sm:$0xff]  ;;  %1882 = vmatpush1.bf16.msra.mxu1 %v1881_v63 }
  0x66   : > { %v511_v33 = vld [vmem:[%s2668_s19 + $0xd8] sm:$0xff]  ;;  %v1861_v34 = vpack.c.bf16 %v493_v31, %v492_v30  ;;  %v494_v35 = vld [vmem:[%s2668_s19 + $0x50] sm:$0xff]  ;;  %v512_v39 = vld [vmem:[%s2668_s19 + $0xe0] sm:$0xff] }
  0x67   : > { %1850 = vmatpush3.bf16.msra.mxu0 %v1849_v15  ;;  %v1863_v37 = vpack.c.bf16 %v511_v33, %v510_v32  ;;  %v495_v38 = vld [vmem:[%s2668_s19 + $0x58] sm:$0xff]  ;;  %v513_v41 = vld [vmem:[%s2668_s19 + $0xe8] sm:$0xff]  ;;  %v496_v44 = vld [vmem:[%s2668_s19 + $0x60] sm:$0xff] }
  0x68   : > { %1852 = vmatprep.subr.bf16.mxu0 %v1851_v16  ;;  %v1865_v48 = vpack.c.bf16 %v495_v38, %v494_v35  ;;  %v1867_v53 = vpack.c.bf16 %v513_v41, %v512_v39  ;;  %v497_v54 = vld [vmem:[%s2668_s19 + $0x68] sm:$0xff]  ;;  %v514_v59 = vld [vmem:[%s2668_s19 + $0xf0] sm:$0xff]  ;;  %v515_v60 = vld [vmem:[%s2668_s19 + $0xf8] sm:$0xff]  ;;  %v2454_v38 = vmov 0.0  }
  0x69   : > { %v1869_v0 = vpack.c.bf16 %v497_v54, %v496_v44  ;;  %v680_v2 = vld [vmem:[%s3021_s7 + $0x58] sm:$0xff]  ;;  %v677_v3 = vld [vmem:[%s3021_s7 + $0x40] sm:$0xff]  ;;  %v1871_v4 = vpack.c.bf16 %v515_v60, %v514_v59  ;;  %v498_v5 = vld [vmem:[%s2668_s19 + $0x70] sm:$0xff]  ;;  %774 = vmatprep.mubr.f32.mxu1 %v2454_v38 }
  0x6a   : > { %v499_v6 = vld [vmem:[%s2668_s19 + $0x78] sm:$0xff]  ;;  %v1883_v7 = vpack.c.bf16 %v680_v2, %v678_v1  ;;  %v679_v8 = vld [vmem:[%s3021_s7 + $0x50] sm:$0xff]  ;;  %v953_v13 = vld [vmem:[#allocation2] sm:$0x1]  ;;  %s1663_s19 = sshll.u32 %s382_s26, 4  ;;  %s2972_s19 = int_to_ptr.vmem [resolvable:$true] %s1663_s19 }
  0x6b   : > { %1854 = vmatpush3.bf16.msra.mxu0 %v1853_v21  ;;  %v522_v9 = vld [vmem:[%s3018_s4 + $0x30] sm:$0xff]  ;;  %v523_v10 = vld [vmem:[%s3018_s4 + $0x38] sm:$0xff]  ;;  %v1885_v11 = vpack.c.bf16 %v679_v8, %v677_v3  ;;  %v1873_v12 = vpack.c.bf16 %v499_v6, %v498_v5  ;;  %v468_v14 = vld [vmem:[%s3017_s3] sm:$0xff]  ;;  %s2375_s27 = scalar_lea.vmem %s2972_s19, 128 }
  0x6c   : > { %1856 = vmatprep.subr.bf16.mxu0 %v1855_v22  ;;  %1884 = vmatprep.subr.bf16.mxu1 %v1883_v7  ;;  %v471_v15 = vld [vmem:[%s3017_s3 + $0x18] sm:$0xff]  ;;  %v470_v16 = vld [vmem:[%s3017_s3 + $0x10] sm:$0xff]  ;;  %v473_v17 = vld [vmem:[%s3017_s3 + $0x28] sm:$0xff]  ;;  %p2376_p6 = scmp.ne.s32.totalorder %s2972_s19, %s2375_s27 }
  0x6d   : > { %556 = vperm.xlu0 %2307, %v522_v9   ;;  %561 = vperm.xlu1 %2308, %v523_v10   ;;  %v472_v18 = vld [vmem:[%s3017_s3 + $0x20] sm:$0xff]  ;;  %v475_v19 = vld [vmem:[%s3017_s3 + $0x38] sm:$0xff]  ;;  %v474_v20 = vld [vmem:[%s3017_s3 + $0x30] sm:$0xff] }
  0x6e   : > { %1886 = vmatpush1.bf16.msra.mxu1 %v1885_v11  ;;  %v477_v21 = vld [vmem:[%s3017_s3 + $0x48] sm:$0xff]  ;;  %v476_v22 = vld [vmem:[%s3017_s3 + $0x40] sm:$0xff]  ;;  %v479_v23 = vld [vmem:[%s3017_s3 + $0x58] sm:$0xff]  ;;  %p2377_p8 = pnand %p2376_p6, %p2601_p12 }
  0x6f   : > { %1858 = vmatpush3.bf16.msra.mxu0 %v1857_v28  ;;  %v478_v24 = vld [vmem:[%s3017_s3 + $0x50] sm:$0xff]  ;;  %v481_v25 = vld [vmem:[%s3017_s3 + $0x68] sm:$0xff]  ;;  %v480_v26 = vld [vmem:[%s3017_s3 + $0x60] sm:$0xff] }
  0x70   : > { %1860 = vmatprep.subr.bf16.mxu0 %v1859_v29  ;;  %v482_v28 = vld [vmem:[%s3017_s3 + $0x70] sm:$0xff]  ;;  %v682_v29 = vld [vmem:[%s3021_s7 + $0x68] sm:$0xff]  ;;  %v684_v30 = vld [vmem:[%s3021_s7 + $0x78] sm:$0xff]  ;;  %p2378_p10 = pneg %p2377_p8 }
  0x71   : > { %956 = vperm.xlu0 %2307, %v953_v13   ;;  %v1887_v31 = vpack.c.bf16 %v684_v30, %v682_v29  ;;  %v681_v32 = vld [vmem:[%s3021_s7 + $0x60] sm:$0xff]  ;;  %v683_v33 = vld [vmem:[%s3021_s7 + $0x70] sm:$0xff] }
  0x72   : > { %v405_v35 = vld [vmem:[%s2653_s20 + $0x8] sm:$0xff]  ;;  %v407_v36 = vld [vmem:[%s2653_s20 + $0x18] sm:$0xff]  ;;  %v404_v40 = vld [vmem:[%s2653_s20] sm:$0xff] }
  0x73   : > { %1862 = vmatpush3.bf16.msra.mxu0 %v1861_v34  ;;  %v1889_v34 = vpack.c.bf16 %v683_v33, %v681_v32  ;;  %1888 = vmatprep.subr.bf16.mxu1 %v1887_v31  ;;  %v406_v41 = vld [vmem:[%s2653_s20 + $0x10] sm:$0xff]  ;;  %v409_v44 = vld [vmem:[%s2653_s20 + $0x28] sm:$0xff]  ;;  %v411_v45 = vld [vmem:[%s2653_s20 + $0x38] sm:$0xff] }
  0x74   : > { %1864 = vmatprep.subr.bf16.mxu0 %v1863_v37  ;;  %v1891_v37 = vpack.c.bf16 %v407_v36, %v405_v35  ;;  %v1893_v47 = vpack.c.bf16 %v406_v41, %v404_v40  ;;  %v1895_v50 = vpack.c.bf16 %v411_v45, %v409_v44  ;;  %v408_v51 = vld [vmem:[%s2653_s20 + $0x20] sm:$0xff]  ;;  %v410_v52 = vld [vmem:[%s2653_s20 + $0x30] sm:$0xff]  ;;  %v413_v54 = vld [vmem:[%s2653_s20 + $0x48] sm:$0xff] }
  0x75   : > { %1890 = vmatpush1.bf16.msra.mxu1 %v1889_v34  ;;  %v415_v55 = vld [vmem:[%s2653_s20 + $0x58] sm:$0xff]  ;;  %v1897_v58 = vpack.c.bf16 %v410_v52, %v408_v51  ;;  %v412_v63 = vld [vmem:[%s2653_s20 + $0x40] sm:$0xff]  ;;  %v417_v2 = vld [vmem:[%s2653_s20 + $0x68] sm:$0xff] }
  0x76   : > { %1892 = vmatprep.subr.bf16.mxu1 %v1891_v37  ;;  %v1899_v62 = vpack.c.bf16 %v415_v55, %v413_v54  ;;  %v419_v3 = vld [vmem:[%s2653_s20 + $0x78] sm:$0xff]  ;;  %v416_v9 = vld [vmem:[%s2653_s20 + $0x60] sm:$0xff]  ;;  %v418_v10 = vld [vmem:[%s2653_s20 + $0x70] sm:$0xff] }
  0x77   : > { %1866 = vmatpush3.bf16.msra.mxu0 %v1865_v48  ;;  %v1903_v8 = vpack.c.bf16 %v419_v3, %v417_v2  ;;  %v421_v13 = vld [vmem:[%s2653_s20 + $0x88] sm:$0xff]  ;;  %v424_v31 = vld [vmem:[%s2653_s20 + $0xa0] sm:$0xff]  ;;  %v426_v32 = vld [vmem:[%s2653_s20 + $0xb0] sm:$0xff] }
  0x78   : > { %1868 = vmatprep.subr.bf16.mxu0 %v1867_v53  ;;  %v429_v35 = vld [vmem:[%s2653_s20 + $0xc8] sm:$0xff]  ;;  %v431_v36 = vld [vmem:[%s2653_s20 + $0xd8] sm:$0xff]  ;;  %v430_v44 = vld [vmem:[%s2653_s20 + $0xd0] sm:$0xff] }
  0x79   : > { %v434_v54 = vld [vmem:[%s2653_s20 + $0xf0] sm:$0xff]  ;;  %v389_v2 = vld [vmem:[%s3016_s2 + $0x8] sm:$0xff] }
  0x7a   : > { %v441_v3 = vld [vmem:[%s2653_s20 + $0x128] sm:$0xff] }
  0x7b   : > { %1870 = vmatpush3.bf16.msra.mxu0 %v1869_v0  ;;  %v414_v0 = vld [vmem:[%s2653_s20 + $0x50] sm:$0xff] }
  0x7c   : > { %1872 = vmatprep.subr.bf16.mxu0 %v1871_v4  ;;  %v1901_v5 = vpack.c.bf16 %v414_v0, %v412_v63  ;;  %v436_v63 = vld [vmem:[%s2653_s20 + $0x100] sm:$0xff]  ;;  %v438_v0 = vld [vmem:[%s2653_s20 + $0x110] sm:$0xff] }
  0x7f   : > { %1874 = vmatpush3.bf16.msra.mxu0 %v1873_v12 }
  0x82   : > { %629 = vmatmul.mubr.f32.vlgmr.msra.gmra.mrb[0].mxu0 %v468_v14  ;;  %v423_v14 = vld [vmem:[%s2653_s20 + $0x98] sm:$0xff] }
  0x83   : > { %633 = vmatprep.mubr.f32.mxu0 %v471_v15 }
  0x86   : > { %634 = vmatmul.mubr.f32.gmra.mrb[2].mxu0 %v470_v16  ;;  %v1905_v16 = vpack.c.bf16 %v418_v10, %v416_v9  ;;  %v447_v9 = vld [vmem:[%s2653_s20 + $0x158] sm:$0xff] }
  0x87   : > { %638 = vmatprep.mubr.f32.mxu0 %v473_v17 }
  0x8a   : > { %639 = vmatmul.mubr.f32.gmra.mrb[4].mxu0 %v472_v18 }
  0x8b   : > { %643 = vmatprep.mubr.f32.mxu0 %v475_v19  ;;  %v1907_v19 = vpack.c.bf16 %v423_v14, %v421_v13  ;;  %v446_v13 = vld [vmem:[%s2653_s20 + $0x150] sm:$0xff]  ;;  %v449_v14 = vld [vmem:[%s2653_s20 + $0x168] sm:$0xff] }
  0x8e   : > { %644 = vmatmul.mubr.f32.gmra.mrb[6].mxu0 %v474_v20  ;;  %v420_v20 = vld [vmem:[%s2653_s20 + $0x80] sm:$0xff] }
  0x8f   : > { %648 = vmatprep.mubr.f32.mxu0 %v477_v21  ;;  %v422_v21 = vld [vmem:[%s2653_s20 + $0x90] sm:$0xff] }
  0x92   : > { %649 = vmatmul.mubr.f32.gmra.mrb[8].mxu0 %v476_v22 }
  0x93   : > { %653 = vmatprep.mubr.f32.mxu0 %v479_v23  ;;  %v425_v23 = vld [vmem:[%s2653_s20 + $0xa8] sm:$0xff] }
  0x96   : > { %654 = vmatmul.mubr.f32.gmra.mrb[10].mxu0 %v478_v24  ;;  %v427_v24 = vld [vmem:[%s2653_s20 + $0xb8] sm:$0xff] }
  0x97   : > { %658 = vmatprep.mubr.f32.mxu0 %v481_v25  ;;  %v1911_v30 = vpack.c.bf16 %v427_v24, %v425_v23  ;;  %v452_v24 = vld [vmem:[%s2653_s20 + $0x180] sm:$0xff] }
  0x9a   : > { %659 = vmatmul.mubr.f32.gmra.mrb[12].mxu0 %v480_v26 }
  0x9b   : > { %663 = vmatprep.mubr.f32.mxu0 %v483_v27  ;;  %v1909_v27 = vpack.c.bf16 %v422_v21, %v420_v20  ;;  %v453_v20 = vld [vmem:[%s2653_s20 + $0x188] sm:$0xff]  ;;  %v455_v21 = vld [vmem:[%s2653_s20 + $0x198] sm:$0xff] }
  0x9c   : > { %v1939_v23 = vpack.c.bf16 %v455_v21, %v453_v20  ;;  %v1116_v20 = vld [vmem:[#allocation6 + $0x218] sm:$0xff] }
  0x9d   : > { %v1124_v21 = vld [vmem:[#allocation6 + $0x258] sm:$0xff] }
  0x9e   : > { %664 = vmatmul.mubr.f32.gmra.mrb[14].mxu0 %v482_v28 }
  0x9f   : > { %1030 = vmatprep.mubr.f32.mxu0 %v2454_v38 }
  0xda   : > { %v527_v42 = vpop.permute.xlu0 %526 }
  0xdb   : > { %v537_v59 = vpop.permute.xlu1 %536 }
  0xde   : > { %v532_v57 = vpop.permute.xlu0 %531 }
  0xdf   : > { %v542_v12 = vpop.permute.xlu1 %541 }
  0xe2   : > { %v547_v26 = vpop.permute.xlu0 %546 }
  0xe3   : > { %v552_v34 = vpop.permute.xlu1 %551 }
 0x155   : > { %v1819_v39 = vpop.f32.mrb[0].mxu0 }
 0x156   : > { %v1820_v43 = vpop.f32.mrb[1].mxu0 }
 0x157   : > { %v1821_v46 = vadd.f32 %v1820_v43, %v1819_v39  ;;  %v1913_v39 = vpack.c.bf16 %v426_v32, %v424_v31  ;;  %v428_v43 = vld [vmem:[%s2653_s20 + $0xc0] sm:$0xff]  ;;  %v458_v31 = vld [vmem:[%s2653_s20 + $0x1b0] sm:$0xff]  ;;  %v461_v32 = vld [vmem:[%s2653_s20 + $0x1c8] sm:$0xff] }
 0x159   : > { %v631_v48 = vadd.f32 %v1821_v46, %v527_v42  ;;  %v1822_v49 = vpop.f32.mrb[2].mxu0  ;;  %v1915_v42 = vpack.c.bf16 %v431_v36, %v429_v35  ;;  %v433_v46 = vld [vmem:[%s2653_s20 + $0xe8] sm:$0xff]  ;;  %v460_v36 = vld [vmem:[%s2653_s20 + $0x1c0] sm:$0xff] }
 0x15a   : > { %v1823_v53 = vpop.f32.mrb[3].mxu0 }
 0x15b   : > { %v1824_v56 = vadd.f32 %v1823_v53, %v1822_v49  ;;  %1768 = vmatmul.mubr.msk.f32.vlgmr.msra.gmra.mrb[0].mxu1 %vm685_vm0, %v631_v48  ;;  %v557_v49 = vpop.permute.xlu0 %556  ;;  %v432_v53 = vld [vmem:[%s2653_s20 + $0xe0] sm:$0xff] }
 0x15c   : > { %1894 = vmatpush1.bf16.msra.mxu1 %v1893_v47  ;;  %780 = vmatprep.mubr.f32.mxu1 %v2454_v38  ;;  %v435_v47 = vld [vmem:[%s2653_s20 + $0xf8] sm:$0xff] }
 0x15d   : > { %v636_v60 = vadd.f32 %v1824_v56, %v532_v57  ;;  %v1825_v61 = vpop.f32.mrb[4].mxu0  ;;  %1896 = vmatprep.subr.bf16.mxu1 %v1895_v50  ;;  %v1917_v50 = vpack.c.bf16 %v430_v44, %v428_v43  ;;  %v1919_v52 = vpack.c.bf16 %v435_v47, %v433_v46  ;;  %v437_v56 = vld [vmem:[%s2653_s20 + $0x108] sm:$0xff]  ;;  %v439_v57 = vld [vmem:[%s2653_s20 + $0x118] sm:$0xff]  ;;  %v464_v43 = vld [vmem:[%s2653_s20 + $0x1e0] sm:$0xff] }
 0x15e   : > { %v1826_v1 = vpop.f32.mrb[5].mxu0  ;;  %v466_v44 = vld [vmem:[%s2653_s20 + $0x1f0] sm:$0xff]  ;;  %v388_v46 = vld [vmem:[%s3016_s2] sm:$0xff] }
 0x15f   : > { %v1827_v4 = vadd.f32 %v1826_v1, %v1825_v61  ;;  %1769 = vmatmul.mubr.msk.f32.gmra.mrb[2].mxu1 %vm685_vm0, %v636_v60  ;;  %v1921_v61 = vpack.c.bf16 %v434_v54, %v432_v53  ;;  %v391_v47 = vld [vmem:[%s3016_s2 + $0x18] sm:$0xff]  ;;  %v397_v53 = vld [vmem:[%s3016_s2 + $0x48] sm:$0xff]  ;;  %v396_v54 = vld [vmem:[%s3016_s2 + $0x40] sm:$0xff] }
 0x160   : > { %1898 = vmatpush1.bf16.msra.mxu1 %v1897_v58  ;;  %786 = vmatprep.mubr.f32.mxu1 %v2454_v38 }
 0x161   : > { %v641_v6 = vadd.f32 %v1827_v4, %v537_v59  ;;  %v1828_v7 = vpop.f32.mrb[6].mxu0  ;;  %1900 = vmatprep.subr.bf16.mxu1 %v1899_v62  ;;  %v562_v59 = vpop.permute.xlu1 %561  ;;  %v1923_v62 = vpack.c.bf16 %v439_v57, %v437_v56  ;;  %v443_v4 = vld [vmem:[%s2653_s20 + $0x138] sm:$0xff]  ;;  %v398_v56 = vld [vmem:[%s3016_s2 + $0x50] sm:$0xff]  ;;  %v401_v57 = vld [vmem:[%s3016_s2 + $0x68] sm:$0xff] }
 0x162   : > { %v1829_v11 = vpop.f32.mrb[7].mxu0 }
 0x163   : > { %v1830_v15 = vadd.f32 %v1829_v11, %v1828_v7  ;;  %1770 = vmatmul.mubr.msk.f32.gmra.mrb[4].mxu1 %vm685_vm0, %v641_v6  ;;  %v440_v6 = vld [vmem:[%s2653_s20 + $0x120] sm:$0xff]  ;;  %v442_v7 = vld [vmem:[%s2653_s20 + $0x130] sm:$0xff] }
 0x164   : > { %1902 = vmatpush1.bf16.msra.mxu1 %v1901_v5  ;;  %792 = vmatprep.mubr.f32.mxu1 %v2454_v38  ;;  %v1927_v5 = vpack.c.bf16 %v443_v4, %v441_v3  ;;  %v1929_v10 = vpack.c.bf16 %v442_v7, %v440_v6  ;;  %v1068_v3 = vld [vmem:[#allocation6 + $0x98] sm:$0xff]  ;;  %v1075_v6 = vld [vmem:[#allocation6 + $0xd0] sm:$0xff] }
 0x165   : > { %v646_v17 = vadd.f32 %v1830_v15, %v542_v12  ;;  %v1831_v18 = vpop.f32.mrb[8].mxu0  ;;  %1904 = vmatprep.subr.bf16.mxu1 %v1903_v8  ;;  %v445_v8 = vld [vmem:[%s2653_s20 + $0x148] sm:$0xff]  ;;  %v444_v12 = vld [vmem:[%s2653_s20 + $0x140] sm:$0xff]  ;;  %v451_v15 = vld [vmem:[%s2653_s20 + $0x178] sm:$0xff] }
 0x166   : > { %v1832_v22 = vpop.f32.mrb[9].mxu0  ;;  %v1931_v11 = vpack.c.bf16 %v447_v9, %v445_v8  ;;  %v1076_v4 = vld [vmem:[#allocation6 + $0xd8] sm:$0xff] }
 0x167   : > { %v1833_v25 = vadd.f32 %v1832_v22, %v1831_v18  ;;  %1771 = vmatmul.mubr.msk.f32.gmra.mrb[6].mxu1 %vm685_vm0, %v646_v17  ;;  %v1935_v17 = vpack.c.bf16 %v451_v15, %v449_v14  ;;  %v448_v18 = vld [vmem:[%s2653_s20 + $0x160] sm:$0xff]  ;;  %v1084_v8 = vld [vmem:[#allocation6 + $0x118] sm:$0xff] }
 0x168   : > { %1906 = vmatpush1.bf16.msra.mxu1 %v1905_v16  ;;  %798 = vmatprep.mubr.f32.mxu1 %v2454_v38  ;;  %v1933_v16 = vpack.c.bf16 %v446_v13, %v444_v12  ;;  %v1092_v9 = vld [vmem:[#allocation6 + $0x158] sm:$0xff]  ;;  %v1091_v12 = vld [vmem:[#allocation6 + $0x150] sm:$0xff] }
 0x169   : > { %v651_v28 = vadd.f32 %v1833_v25, %v547_v26  ;;  %v1834_v29 = vpop.f32.mrb[10].mxu0  ;;  %1908 = vmatprep.subr.bf16.mxu1 %v1907_v19  ;;  %v450_v19 = vld [vmem:[%s2653_s20 + $0x170] sm:$0xff]  ;;  %v457_v26 = vld [vmem:[%s2653_s20 + $0x1a8] sm:$0xff]  ;;  %v1100_v14 = vld [vmem:[#allocation6 + $0x198] sm:$0xff] }
 0x16a   : > { %v1835_v33 = vpop.f32.mrb[11].mxu0  ;;  %v1937_v22 = vpack.c.bf16 %v450_v19, %v448_v18  ;;  %v454_v25 = vld [vmem:[%s2653_s20 + $0x190] sm:$0xff]  ;;  %v1108_v15 = vld [vmem:[#allocation6 + $0x1d8] sm:$0xff] }
 0x16b   : > { %v1836_v37 = vadd.f32 %v1835_v33, %v1834_v29  ;;  %1772 = vmatmul.mubr.msk.f32.gmra.mrb[8].mxu1 %vm685_vm0, %v651_v28  ;;  %v1941_v28 = vpack.c.bf16 %v454_v25, %v452_v24  ;;  %v463_v33 = vld [vmem:[%s2653_s20 + $0x1d8] sm:$0xff]  ;;  %v1107_v18 = vld [vmem:[#allocation6 + $0x1d0] sm:$0xff] }
 0x16c   : > { %1910 = vmatpush1.bf16.msra.mxu1 %v1909_v27  ;;  %804 = vmatprep.mubr.f32.mxu1 %v2454_v38  ;;  %v459_v27 = vld [vmem:[%s2653_s20 + $0x1b8] sm:$0xff]  ;;  %v1947_v35 = vpack.c.bf16 %v463_v33, %v461_v32  ;;  %v1123_v24 = vld [vmem:[#allocation6 + $0x250] sm:$0xff] }
 0x16d   : > { %v656_v40 = vadd.f32 %v1836_v37, %v552_v34  ;;  %v1837_v41 = vpop.f32.mrb[12].mxu0  ;;  %1912 = vmatprep.subr.bf16.mxu1 %v1911_v30  ;;  %v1943_v29 = vpack.c.bf16 %v459_v27, %v457_v26  ;;  %v456_v30 = vld [vmem:[%s2653_s20 + $0x1a0] sm:$0xff]  ;;  %v462_v37 = vld [vmem:[%s2653_s20 + $0x1d0] sm:$0xff]  ;;  %v1132_v26 = vld [vmem:[#allocation6 + $0x298] sm:$0xff] }
 0x16e   : > { %v1838_v45 = vpop.f32.mrb[13].mxu0  ;;  %v1945_v34 = vpack.c.bf16 %v458_v31, %v456_v30  ;;  %v1140_v27 = vld [vmem:[#allocation6 + $0x2d8] sm:$0xff]  ;;  %v1139_v30 = vld [vmem:[#allocation6 + $0x2d0] sm:$0xff] }
 0x16f   : > { %v1839_v48 = vadd.f32 %v1838_v45, %v1837_v41  ;;  %1773 = vmatmul.mubr.msk.f32.gmra.mrb[10].mxu1 %vm685_vm0, %v656_v40  ;;  %v467_v40 = vld [vmem:[%s2653_s20 + $0x1f8] sm:$0xff]  ;;  %v1949_v41 = vpack.c.bf16 %v462_v37, %v460_v36  ;;  %v1953_v45 = vpack.c.bf16 %v466_v44, %v464_v43  ;;  %v1155_v36 = vld [vmem:[#allocation6 + $0x350] sm:$0xff] }
 0x170   : > { %1914 = vmatpush1.bf16.msra.mxu1 %v1913_v39  ;;  %810 = vmatprep.mubr.f32.mxu1 %v2454_v38  ;;  %v465_v39 = vld [vmem:[%s2653_s20 + $0x1e8] sm:$0xff]  ;;  %v1148_v32 = vld [vmem:[#allocation6 + $0x318] sm:$0xff]  ;;  %v1171_v43 = vld [vmem:[#allocation6 + $0x3d0] sm:$0xff]  ;;  %s1786_s20 = sshll.u32 %s2531_s6, 7  ;;  %s2456_s6 = smov [#allocation8]  }
 0x171   : > { %v661_v51 = vadd.f32 %v1839_v48, %v557_v49  ;;  %1916 = vmatprep.subr.bf16.mxu1 %v1915_v42  ;;  %v1840_v55 = vpop.f32.mrb[14].mxu0  ;;  %v1951_v42 = vpack.c.bf16 %v467_v40, %v465_v39  ;;  %v390_v48 = vld [vmem:[%s3016_s2 + $0x10] sm:$0xff]  ;;  %v393_v49 = vld [vmem:[%s3016_s2 + $0x28] sm:$0xff]  ;;  %v1156_v33 = vld [vmem:[#allocation6 + $0x358] sm:$0xff]  ;;  %s2970_s16 = scalar_lea.hbm %s3023_s9, %s1786_s20  ;;  %s2379_s25 = sshll.u32 %s2456_s6, 4  ;;  %s2380_s25 = int_to_ptr.vmem [resolvable:$false] %s2379_s25 }
 0x172   : > { %v1841_v58 = vpop.f32.mrb[15].mxu0  ;;  %v1164_v39 = vld [vmem:[#allocation6 + $0x398] sm:$0xff]  ;;  %s2381_s10 = scalar_lea.vmem %s2380_s25, 256  ;;  %p2382_p13 = scmp.lt.s32.totalorder %s2972_s19, %s2380_s25 }
 0x173   : > { %1774 = vmatmul.mubr.msk.f32.gmra.mrb[12].mxu1 %vm685_vm0, %v661_v51  ;;  %v1842_v60 = vadd.f32 %v1841_v58, %v1840_v55  ;;  %v395_v51 = vld [vmem:[%s3016_s2 + $0x38] sm:$0xff]  ;;  %v400_v58 = vld [vmem:[%s3016_s2 + $0x60] sm:$0xff]  ;;  %p2383_p3 = scmp.lt.s32.totalorder %s2381_s10, %s2375_s27 }
 0x174   : > { %1918 = vmatpush1.bf16.msra.mxu1 %v1917_v50  ;;  %816 = vmatprep.mubr.f32.mxu1 %v2454_v38  ;;  %v1925_v38 = vpack.c.bf16 %v438_v0, %v436_v63  ;;  %v392_v50 = vld [vmem:[%s3016_s2 + $0x20] sm:$0xff]  ;;  %v399_v55 = vld [vmem:[%s3016_s2 + $0x58] sm:$0xff] }
 0x175   : > { %1920 = vmatprep.subr.bf16.mxu1 %v1919_v52  ;;  %v666_v1 = vadd.f32 %v1842_v60, %v562_v59  ;;  %v394_v52 = vld [vmem:[%s3016_s2 + $0x30] sm:$0xff]  ;;  %v403_v59 = vld [vmem:[%s3016_s2 + $0x78] sm:$0xff]  ;;  %p2384_p7 = por %p2383_p3, %p2382_p13 }
 0x176   : > { %v402_v60 = vld [vmem:[%s3016_s2 + $0x70] sm:$0xff]  ;;  %v1172_v40 = vld [vmem:[#allocation6 + $0x3d8] sm:$0xff] }
 0x177   : > { %1775 = vmatmul.mubr.msk.f32.gmra.mrb[14].mxu1 %vm685_vm0, %v666_v1  ;;  %v1051_v0 = vld [vmem:[#allocation6 + $0x10] sm:$0xff]  ;;  %p2385_p9 = pnand %p2384_p7, %p2378_p10 }
 0x178   : > { %1922 = vmatpush1.bf16.msra.mxu1 %v1921_v61  ;;  %887 = vmatprep.mubr.f32.mxu1 %v389_v2  ;;  %v1052_v61 = vld [vmem:[#allocation6 + $0x18] sm:$0xff]  ;;  %v1059_v1 = vld [vmem:[#allocation6 + $0x50] sm:$0xff] }
 0x179   : > { %1924 = vmatprep.subr.bf16.mxu1 %v1923_v62  ;;  %v1060_v62 = vld [vmem:[#allocation6 + $0x58] sm:$0xff]  ;;  %v2037_v2 = vpack.c.bf16 %v1059_v1, %v1051_v0 }
 0x17a   : > { %v2035_v63 = vpack.c.bf16 %v1060_v62, %v1052_v61 }
 0x17c   : > { %1926 = vmatpush1.bf16.msra.mxu1 %v1925_v38  ;;  %v2039_v38 = vpack.c.bf16 %v1076_v4, %v1068_v3 }
 0x17d   : > { %1928 = vmatprep.subr.bf16.mxu1 %v1927_v5  ;;  %v1067_v5 = vld [vmem:[#allocation6 + $0x90] sm:$0xff] }
 0x17e   : > { %v2041_v7 = vpack.c.bf16 %v1075_v6, %v1067_v5 }
 0x180   : > { %1930 = vmatpush1.bf16.msra.mxu1 %v1929_v10  ;;  %v2043_v10 = vpack.c.bf16 %v1092_v9, %v1084_v8 }
 0x181   : > { %1932 = vmatprep.subr.bf16.mxu1 %v1931_v11  ;;  %v1083_v11 = vld [vmem:[#allocation6 + $0x110] sm:$0xff] }
 0x182   : > { %v2045_v13 = vpack.c.bf16 %v1091_v12, %v1083_v11 }
 0x184   : > { %1934 = vmatpush1.bf16.msra.mxu1 %v1933_v16  ;;  %v2047_v16 = vpack.c.bf16 %v1108_v15, %v1100_v14 }
 0x185   : > { %1936 = vmatprep.subr.bf16.mxu1 %v1935_v17  ;;  %v1099_v17 = vld [vmem:[#allocation6 + $0x190] sm:$0xff] }
 0x186   : > { %v2049_v19 = vpack.c.bf16 %v1107_v18, %v1099_v17 }
 0x188   : > { %1938 = vmatpush1.bf16.msra.mxu1 %v1937_v22  ;;  %v2051_v22 = vpack.c.bf16 %v1124_v21, %v1116_v20 }
 0x189   : > { %1940 = vmatprep.subr.bf16.mxu1 %v1939_v23  ;;  %v1115_v23 = vld [vmem:[#allocation6 + $0x210] sm:$0xff] }
 0x18a   : > { %v2053_v25 = vpack.c.bf16 %v1123_v24, %v1115_v23  ;;  %v1058_v23 = vld [vmem:[#allocation6 + $0x48] sm:$0xff] }
 0x18c   : > { %1942 = vmatpush1.bf16.msra.mxu1 %v1941_v28  ;;  %v2055_v28 = vpack.c.bf16 %v1140_v27, %v1132_v26 }
 0x18d   : > { %1944 = vmatprep.subr.bf16.mxu1 %v1943_v29  ;;  %v1131_v29 = vld [vmem:[#allocation6 + $0x290] sm:$0xff] }
 0x18e   : > { %v2057_v31 = vpack.c.bf16 %v1139_v30, %v1131_v29  ;;  %v1049_v29 = vld [vmem:[#allocation6] sm:$0xff] }
 0x18f   : > { %v1057_v30 = vld [vmem:[#allocation6 + $0x40] sm:$0xff] }
 0x190   : > { %1946 = vmatpush1.bf16.msra.mxu1 %v1945_v34  ;;  %v2059_v34 = vpack.c.bf16 %v1156_v33, %v1148_v32  ;;  %v1074_v32 = vld [vmem:[#allocation6 + $0xc8] sm:$0xff]  ;;  %v952_v33 = vld [vmem:[%s3019_s5] sm:$0x1] }
 0x191   : > { %1948 = vmatprep.subr.bf16.mxu1 %v1947_v35  ;;  %v1147_v35 = vld [vmem:[#allocation6 + $0x310] sm:$0xff] }
 0x192   : > { %v2061_v37 = vpack.c.bf16 %v1155_v36, %v1147_v35  ;;  %v1065_v36 = vld [vmem:[#allocation6 + $0x80] sm:$0xff] }
 0x194   : > { %1950 = vmatpush1.bf16.msra.mxu1 %v1949_v41  ;;  %v2063_v41 = vpack.c.bf16 %v1172_v40, %v1164_v39  ;;  %v1082_v39 = vld [vmem:[#allocation6 + $0x108] sm:$0xff] }
 0x195   : > { %1952 = vmatprep.subr.bf16.mxu1 %v1951_v42  ;;  %v1163_v42 = vld [vmem:[#allocation6 + $0x390] sm:$0xff]  ;;  %v1090_v40 = vld [vmem:[#allocation6 + $0x148] sm:$0xff] }
 0x196   : > { %v2065_v44 = vpack.c.bf16 %v1171_v43, %v1163_v42  ;;  %v1979_v42 = vpack.c.bf16 %v1090_v40, %v1082_v39  ;;  %v1081_v43 = vld [vmem:[#allocation6 + $0x100] sm:$0xff]  ;;  %v1211_v39 = vld [vmem:[#allocation6 + $0x510] sm:$0xff] }
 0x197   : > { %v1219_v40 = vld [vmem:[#allocation6 + $0x550] sm:$0xff] }
 0x198   : > { %1954 = vmatpush1.bf16.msra.mxu1 %v1953_v45  ;;  %v1180_v45 = vld [vmem:[#allocation6 + $0x418] sm:$0xff] }
 0x199   : > { %2036 = vmatprep.subr.bf16.mxu1 %v2035_v63 }
 0x19b   : > { %888 = vmatmul.mubr.f32.vlgmr.msra.gmra.mrb[0].mxu1 %v388_v46  ;;  %v1188_v46 = vld [vmem:[#allocation6 + $0x458] sm:$0xff] }
 0x19c   : > { %893 = vmatprep.mubr.f32.mxu1 %v391_v47  ;;  %2038 = vmatpush1.bf16.msra.mxu1 %v2037_v2  ;;  %v2067_v47 = vpack.c.bf16 %v1188_v46, %v1180_v45  ;;  %v1098_v45 = vld [vmem:[#allocation6 + $0x188] sm:$0xff] }
 0x19d   : > { %2040 = vmatprep.subr.bf16.mxu1 %v2039_v38  ;;  %v1106_v46 = vld [vmem:[#allocation6 + $0x1c8] sm:$0xff] }
 0x19f   : > { %894 = vmatmul.mubr.f32.gmra.mrb[2].mxu1 %v390_v48  ;;  %v1179_v48 = vld [vmem:[#allocation6 + $0x410] sm:$0xff] }
 0x1a0   : > { %899 = vmatprep.mubr.f32.mxu1 %v393_v49  ;;  %2042 = vmatpush1.bf16.msra.mxu1 %v2041_v7  ;;  %v1187_v49 = vld [vmem:[#allocation6 + $0x450] sm:$0xff] }
 0x1a1   : > { %2044 = vmatprep.subr.bf16.mxu1 %v2043_v10 }
 0x1a3   : > { %900 = vmatmul.mubr.f32.gmra.mrb[4].mxu1 %v392_v50  ;;  %v2069_v50 = vpack.c.bf16 %v1187_v49, %v1179_v48  ;;  %v1983_v48 = vpack.c.bf16 %v1106_v46, %v1098_v45  ;;  %v1097_v49 = vld [vmem:[#allocation6 + $0x180] sm:$0xff]  ;;  %v1236_v46 = vld [vmem:[#allocation6 + $0x5d8] sm:$0xff] }
 0x1a4   : > { %905 = vmatprep.mubr.f32.mxu1 %v395_v51  ;;  %2046 = vmatpush1.bf16.msra.mxu1 %v2045_v13 }
 0x1a5   : > { %2048 = vmatprep.subr.bf16.mxu1 %v2047_v16 }
 0x1a7   : > { %906 = vmatmul.mubr.f32.gmra.mrb[6].mxu1 %v394_v52 }
 0x1a8   : > { %911 = vmatprep.mubr.f32.mxu1 %v397_v53  ;;  %2050 = vmatpush1.bf16.msra.mxu1 %v2049_v19 }
 0x1a9   : > { %2052 = vmatprep.subr.bf16.mxu1 %v2051_v22  ;;  %v1050_v22 = vld [vmem:[#allocation6 + $0x8] sm:$0xff] }
 0x1ab   : > { %912 = vmatmul.mubr.f32.gmra.mrb[8].mxu1 %v396_v54 }
 0x1ac   : > { %917 = vmatprep.mubr.f32.mxu1 %v399_v55  ;;  %2054 = vmatpush1.bf16.msra.mxu1 %v2053_v25 }
 0x1ad   : > { %2056 = vmatprep.subr.bf16.mxu1 %v2055_v28  ;;  %v1971_v28 = vpack.c.bf16 %v1058_v23, %v1050_v22  ;;  %v1193_v22 = vld [vmem:[#allocation6 + $0x480] sm:$0xff] }
 0x1ae   : > { %v1201_v23 = vld [vmem:[#allocation6 + $0x4c0] sm:$0xff] }
 0x1af   : > { %918 = vmatmul.mubr.f32.gmra.mrb[10].mxu1 %v398_v56 }
 0x1b0   : > { %923 = vmatprep.mubr.f32.mxu1 %v401_v57  ;;  %2058 = vmatpush1.bf16.msra.mxu1 %v2057_v31  ;;  %v1066_v31 = vld [vmem:[#allocation6 + $0x88] sm:$0xff] }
 0x1b1   : > { %2060 = vmatprep.subr.bf16.mxu1 %v2059_v34  ;;  %v1973_v34 = vpack.c.bf16 %v1057_v30, %v1049_v29  ;;  %v1975_v35 = vpack.c.bf16 %v1074_v32, %v1066_v31  ;;  %v1210_v29 = vld [vmem:[#allocation6 + $0x508] sm:$0xff]  ;;  %v1212_v31 = vld [vmem:[#allocation6 + $0x518] sm:$0xff] }
 0x1b2   : > { %v1218_v30 = vld [vmem:[#allocation6 + $0x548] sm:$0xff] }
 0x1b3   : > { %924 = vmatmul.mubr.f32.gmra.mrb[12].mxu1 %v400_v58  ;;  %v2011_v32 = vpack.c.bf16 %v1218_v30, %v1210_v29 }
 0x1b4   : > { %929 = vmatprep.mubr.f32.mxu1 %v403_v59  ;;  %2062 = vmatpush1.bf16.msra.mxu1 %v2061_v37  ;;  %v1073_v37 = vld [vmem:[#allocation6 + $0xc0] sm:$0xff] }
 0x1b5   : > { %2064 = vmatprep.subr.bf16.mxu1 %v2063_v41  ;;  %v1977_v41 = vpack.c.bf16 %v1073_v37, %v1065_v36 }
 0x1b7   : > { %930 = vmatmul.mubr.f32.gmra.mrb[14].mxu1 %v402_v60 }
 0x1b8   : > { %2066 = vmatpush1.bf16.msra.mxu1 %v2065_v44  ;;  %v1089_v44 = vld [vmem:[#allocation6 + $0x140] sm:$0xff] }
 0x1b9   : > { %2068 = vmatprep.subr.bf16.mxu1 %v2067_v47  ;;  %v1981_v47 = vpack.c.bf16 %v1089_v44, %v1081_v43  ;;  %v1234_v43 = vld [vmem:[#allocation6 + $0x5c8] sm:$0xff]  ;;  %v1228_v44 = vld [vmem:[#allocation6 + $0x598] sm:$0xff] }
 0x1bc   : > { %2070 = vmatpush1.bf16.msra.mxu1 %v2069_v50  ;;  %v1105_v50 = vld [vmem:[#allocation6 + $0x1c0] sm:$0xff] }
 0x26e   : > { %v889_v51 = vpop.f32.mrb[0].mxu1 }
 0x26f   : > { %v891_v52 = vpop.f32.mrb[1].mxu1  ;;  %v936_v54 = vmax.f32 %v889_v51, 0.0  ;;  %v1114_v51 = vld [vmem:[#allocation6 + $0x208] sm:$0xff] }
 0x270   : > { %v937_v57 = vmax.f32 %v891_v52, 0.0  ;;  %v1122_v52 = vld [vmem:[#allocation6 + $0x248] sm:$0xff] }
 0x272   : > { %v895_v53 = vpop.f32.mrb[2].mxu1 }
 0x273   : > { %v938_v55 = vmax.f32 %v895_v53, 0.0  ;;  %v897_v56 = vpop.f32.mrb[3].mxu1  ;;  %v1985_v53 = vpack.c.bf16 %v1105_v50, %v1097_v49  ;;  %v2079_v49 = vpack.c.bf16 %v1236_v46, %v1228_v44  ;;  %v959_v44 = vlaneseq }
 0x274   : > { %v939_v58 = vmax.f32 %v897_v56, 0.0  ;;  %v1121_v56 = vld [vmem:[#allocation6 + $0x240] sm:$0xff] }
 0x275   : > { %v1957_v59 = vpack.c.bf16 %v938_v55, %v936_v54  ;;  %v1987_v54 = vpack.c.bf16 %v1122_v52, %v1114_v51  ;;  %v1113_v55 = vld [vmem:[#allocation6 + $0x200] sm:$0xff]  ;;  %v1227_v51 = vld [vmem:[#allocation6 + $0x590] sm:$0xff] }
 0x276   : > { %v1955_v60 = vpack.c.bf16 %v939_v58, %v937_v57  ;;  %v901_v61 = vpop.f32.mrb[4].mxu1  ;;  %v1130_v57 = vld [vmem:[#allocation6 + $0x288] sm:$0xff]  ;;  %v1235_v52 = vld [vmem:[#allocation6 + $0x5d0] sm:$0xff] }
 0x277   : > { %v903_v62 = vpop.f32.mrb[5].mxu1  ;;  %v940_v0 = vmax.f32 %v901_v61, 0.0  ;;  %v1138_v58 = vld [vmem:[#allocation6 + $0x2c8] sm:$0xff]  ;;  %v1129_v61 = vld [vmem:[#allocation6 + $0x280] sm:$0xff] }
 0x278   : > { %1956 = vmatprep.subr.bf16.mxu0 %v1955_v60  ;;  %v941_v3 = vmax.f32 %v903_v62, 0.0  ;;  %v1991_v60 = vpack.c.bf16 %v1138_v58, %v1130_v57  ;;  %v1137_v62 = vld [vmem:[#allocation6 + $0x2c0] sm:$0xff]  ;;  %v1252_v58 = vld [vmem:[#allocation6 + $0x658] sm:$0xff] }
 0x279   : > { %1958 = vmatpush1.bf16.msra.mxu0 %v1957_v59  ;;  %v1989_v59 = vpack.c.bf16 %v1121_v56, %v1113_v55  ;;  %v1250_v55 = vld [vmem:[#allocation6 + $0x648] sm:$0xff]  ;;  %v1244_v56 = vld [vmem:[#allocation6 + $0x618] sm:$0xff] }
 0x27a   : > { %v907_v63 = vpop.f32.mrb[6].mxu1 }
 0x27b   : > { %v942_v1 = vmax.f32 %v907_v63, 0.0  ;;  %v909_v2 = vpop.f32.mrb[7].mxu1  ;;  %v1146_v63 = vld [vmem:[#allocation6 + $0x308] sm:$0xff] }
 0x27c   : > { %v943_v4 = vmax.f32 %v909_v2, 0.0 }
 0x27d   : > { %v1961_v38 = vpack.c.bf16 %v942_v1, %v940_v0  ;;  %v1154_v0 = vld [vmem:[#allocation6 + $0x348] sm:$0xff]  ;;  %v1993_v1 = vpack.c.bf16 %v1137_v62, %v1129_v61  ;;  %v2083_v61 = vpack.c.bf16 %v1252_v58, %v1244_v56 }
 0x27e   : > { %v1959_v5 = vpack.c.bf16 %v943_v4, %v941_v3  ;;  %v913_v6 = vpop.f32.mrb[8].mxu1  ;;  %v1995_v2 = vpack.c.bf16 %v1154_v0, %v1146_v63  ;;  %v1145_v3 = vld [vmem:[#allocation6 + $0x300] sm:$0xff]  ;;  %v1243_v63 = vld [vmem:[#allocation6 + $0x610] sm:$0xff] }
 0x27f   : > { %v915_v7 = vpop.f32.mrb[9].mxu1  ;;  %v944_v9 = vmax.f32 %v913_v6, 0.0  ;;  %v1153_v4 = vld [vmem:[#allocation6 + $0x340] sm:$0xff]  ;;  %v1251_v0 = vld [vmem:[#allocation6 + $0x650] sm:$0xff] }
 0x280   : > { %1960 = vmatprep.subr.bf16.mxu0 %v1959_v5  ;;  %v945_v12 = vmax.f32 %v915_v7, 0.0  ;;  %v1170_v5 = vld [vmem:[#allocation6 + $0x3c8] sm:$0xff]  ;;  %v1997_v6 = vpack.c.bf16 %v1153_v4, %v1145_v3  ;;  %v1260_v4 = vld [vmem:[#allocation6 + $0x698] sm:$0xff] }
 0x281   : > { %1962 = vmatpush1.bf16.msra.mxu0 %v1961_v38  ;;  %v1162_v38 = vld [vmem:[#allocation6 + $0x388] sm:$0xff] }
 0x282   : > { %v919_v8 = vpop.f32.mrb[10].mxu1  ;;  %v1999_v7 = vpack.c.bf16 %v1170_v5, %v1162_v38  ;;  %v1266_v3 = vld [vmem:[#allocation6 + $0x6c8] sm:$0xff]  ;;  %v1268_v5 = vld [vmem:[#allocation6 + $0x6d8] sm:$0xff] }
 0x283   : > { %v946_v10 = vmax.f32 %v919_v8, 0.0  ;;  %v921_v11 = vpop.f32.mrb[11].mxu1  ;;  %v1161_v8 = vld [vmem:[#allocation6 + $0x380] sm:$0xff] }
 0x284   : > { %v947_v13 = vmax.f32 %v921_v11, 0.0  ;;  %v1186_v11 = vld [vmem:[#allocation6 + $0x448] sm:$0xff] }
 0x285   : > { %v1965_v14 = vpack.c.bf16 %v946_v10, %v944_v9  ;;  %v1169_v9 = vld [vmem:[#allocation6 + $0x3c0] sm:$0xff]  ;;  %v1178_v10 = vld [vmem:[#allocation6 + $0x408] sm:$0xff] }
 0x286   : > { %v1963_v15 = vpack.c.bf16 %v947_v13, %v945_v12  ;;  %v925_v16 = vpop.f32.mrb[12].mxu1  ;;  %v2001_v12 = vpack.c.bf16 %v1169_v9, %v1161_v8  ;;  %v2003_v13 = vpack.c.bf16 %v1186_v11, %v1178_v10  ;;  %v2087_v8 = vpack.c.bf16 %v1268_v5, %v1260_v4  ;;  %v1259_v10 = vld [vmem:[#allocation6 + $0x690] sm:$0xff]  ;;  %v1077_v5 = vld [vmem:[#allocation6 + $0xe0] sm:$0xff] }
 0x287   : > { %v927_v17 = vpop.f32.mrb[13].mxu1  ;;  %v948_v19 = vmax.f32 %v925_v16, 0.0  ;;  %v1267_v11 = vld [vmem:[#allocation6 + $0x6d0] sm:$0xff] }
 0x288   : > { %1964 = vmatprep.subr.bf16.mxu0 %v1963_v15  ;;  %v949_v24 = vmax.f32 %v927_v17, 0.0  ;;  %v1185_v15 = vld [vmem:[#allocation6 + $0x440] sm:$0xff]  ;;  %v1194_v17 = vld [vmem:[#allocation6 + $0x488] sm:$0xff] }
 0x289   : > { %1966 = vmatpush1.bf16.msra.mxu0 %v1965_v14  ;;  %v1177_v14 = vld [vmem:[#allocation6 + $0x400] sm:$0xff] }
 0x28a   : > { %v931_v18 = vpop.f32.mrb[14].mxu1  ;;  %v2005_v16 = vpack.c.bf16 %v1185_v15, %v1177_v14  ;;  %v1282_v14 = vld [vmem:[#allocation6 + $0x748] sm:$0xff]  ;;  %v1276_v15 = vld [vmem:[#allocation6 + $0x718] sm:$0xff] }
 0x28b   : > { %v950_v20 = vmax.f32 %v931_v18, 0.0  ;;  %v933_v21 = vpop.f32.mrb[15].mxu1  ;;  %v1202_v18 = vld [vmem:[#allocation6 + $0x4c8] sm:$0xff] }
 0x28c   : > { %v951_v25 = vmax.f32 %v933_v21, 0.0  ;;  %v1204_v21 = vld [vmem:[#allocation6 + $0x4d8] sm:$0xff] }
 0x28d   : > { %v1969_v26 = vpack.c.bf16 %v950_v20, %v948_v19  ;;  %v1196_v19 = vld [vmem:[#allocation6 + $0x498] sm:$0xff]  ;;  %v2007_v20 = vpack.c.bf16 %v1202_v18, %v1194_v17  ;;  %v1273_v18 = vld [vmem:[#allocation6 + $0x700] sm:$0xff] }
 0x28e   : > { %v1967_v27 = vpack.c.bf16 %v951_v25, %v949_v24  ;;  %v2071_v24 = vpack.c.bf16 %v1204_v21, %v1196_v19  ;;  %v2009_v25 = vpack.c.bf16 %v1201_v23, %v1193_v22  ;;  %v1284_v17 = vld [vmem:[#allocation6 + $0x758] sm:$0xff]  ;;  %v1281_v19 = vld [vmem:[#allocation6 + $0x740] sm:$0xff]  ;;  %v1275_v22 = vld [vmem:[#allocation6 + $0x710] sm:$0xff] }
 0x28f   : > { %v2029_v21 = vpack.c.bf16 %v1281_v19, %v1273_v18  ;;  %v1283_v23 = vld [vmem:[#allocation6 + $0x750] sm:$0xff]  ;;  %v1085_v18 = vld [vmem:[#allocation6 + $0x120] sm:$0xff] }
 0x290   : > { %1968 = vmatprep.subr.bf16.mxu0 %v1967_v27  ;;  %v1203_v27 = vld [vmem:[#allocation6 + $0x4d0] sm:$0xff]  ;;  %2072 = vmatprep.subr.bf16.mxu1 %v2071_v24  ;;  %v1290_v24 = vld [vmem:[#allocation6 + $0x788] sm:$0xff]  ;;  %v1093_v19 = vld [vmem:[#allocation6 + $0x160] sm:$0xff] }
 0x291   : > { %1970 = vmatpush1.bf16.msra.mxu0 %v1969_v26  ;;  %v1195_v26 = vld [vmem:[#allocation6 + $0x490] sm:$0xff] }
 0x292   : > { %1972 = vmatprep.subr.bf16.mxu0 %v1971_v28  ;;  %v2073_v28 = vpack.c.bf16 %v1203_v27, %v1195_v26  ;;  %v1298_v26 = vld [vmem:[#allocation6 + $0x7c8] sm:$0xff]  ;;  %v1292_v27 = vld [vmem:[#allocation6 + $0x798] sm:$0xff] }
 0x293   : > { %v2031_v29 = vpack.c.bf16 %v1298_v26, %v1290_v24  ;;  %v1102_v24 = vld [vmem:[#allocation6 + $0x1a8] sm:$0xff]  ;;  %v1104_v26 = vld [vmem:[#allocation6 + $0x1b8] sm:$0xff] }
 0x294   : > { %1776 = vmatmul.mubr.msk.f32.vlgmr.msra.gmra.mrb[16].mxu0 %vm685_vm0, %v952_v33  ;;  %2074 = vmatpush1.bf16.msra.mxu1 %v2073_v28  ;;  %v1220_v33 = vld [vmem:[#allocation6 + $0x558] sm:$0xff] }
 0x295   : > { %1974 = vmatpush1.bf16.msra.mxu0 %v1973_v34  ;;  %v1209_v34 = vld [vmem:[#allocation6 + $0x500] sm:$0xff]  ;;  %v2075_v36 = vpack.c.bf16 %v1220_v33, %v1212_v31  ;;  %v1300_v28 = vld [vmem:[#allocation6 + $0x7d8] sm:$0xff]  ;;  %v1291_v33 = vld [vmem:[#allocation6 + $0x790] sm:$0xff] }
 0x296   : > { %1976 = vmatprep.subr.bf16.mxu0 %v1975_v35  ;;  %v1217_v35 = vld [vmem:[#allocation6 + $0x540] sm:$0xff]  ;;  %v2095_v30 = vpack.c.bf16 %v1300_v28, %v1292_v27  ;;  %v1112_v27 = vld [vmem:[#allocation6 + $0x1f8] sm:$0xff]  ;;  %v2109_v28 = vpack.c.bf16 %v1093_v19, %v1085_v18 }
 0x297   : > { %v2013_v37 = vpack.c.bf16 %v1217_v35, %v1209_v34  ;;  %2076 = vmatprep.subr.bf16.mxu1 %v2075_v36  ;;  %v1289_v31 = vld [vmem:[#allocation6 + $0x780] sm:$0xff]  ;;  %v1299_v35 = vld [vmem:[#allocation6 + $0x7d0] sm:$0xff] }
 0x298   : > { %v2097_v36 = vpack.c.bf16 %v1299_v35, %v1291_v33  ;;  %v2175_v33 = vpack.c.bf16 %v1112_v27, %v1104_v26  ;;  %v1111_v35 = vld [vmem:[#allocation6 + $0x1f0] sm:$0xff] }
 0x299   : > { %1978 = vmatpush1.bf16.msra.mxu0 %v1977_v41  ;;  %v2077_v41 = vpack.c.bf16 %v1219_v40, %v1211_v39  ;;  %v1062_v39 = vld [vmem:[#allocation6 + $0x68] sm:$0xff]  ;;  %v1056_v40 = vld [vmem:[#allocation6 + $0x38] sm:$0xff] }
 0x29a   : > { %1980 = vmatprep.subr.bf16.mxu0 %v1979_v42  ;;  %v1226_v42 = vld [vmem:[#allocation6 + $0x588] sm:$0xff] }
 0x29b   : > { %2078 = vmatpush1.bf16.msra.mxu1 %v2077_v41  ;;  %v2015_v45 = vpack.c.bf16 %v1234_v43, %v1226_v42  ;;  %v1064_v42 = vld [vmem:[#allocation6 + $0x78] sm:$0xff] }
 0x29c   : > { %2080 = vmatprep.subr.bf16.mxu1 %v2079_v49  ;;  %v2163_v43 = vpack.c.bf16 %v1064_v42, %v1056_v40  ;;  %v1128_v40 = vld [vmem:[#allocation6 + $0x278] sm:$0xff] }
 0x29d   : > { %1982 = vmatpush1.bf16.msra.mxu0 %v1981_v47  ;;  %v1225_v47 = vld [vmem:[#allocation6 + $0x580] sm:$0xff] }
 0x29e   : > { %1984 = vmatprep.subr.bf16.mxu0 %v1983_v48  ;;  %v1233_v48 = vld [vmem:[#allocation6 + $0x5c0] sm:$0xff] }
 0x29f   : > { %v2017_v50 = vpack.c.bf16 %v1233_v48, %v1225_v47  ;;  %v957_v47 = vpop.permute.xlu0 %956 }
 0x2a1   : > { %1986 = vmatpush1.bf16.msra.mxu0 %v1985_v53  ;;  %v2081_v53 = vpack.c.bf16 %v1235_v52, %v1227_v51 }
 0x2a2   : > { %1988 = vmatprep.subr.bf16.mxu0 %v1987_v54  ;;  %v1242_v54 = vld [vmem:[#allocation6 + $0x608] sm:$0xff] }
 0x2a3   : > { %2082 = vmatpush1.bf16.msra.mxu1 %v2081_v53  ;;  %v2019_v57 = vpack.c.bf16 %v1250_v55, %v1242_v54 }
 0x2a4   : > { %2084 = vmatprep.subr.bf16.mxu1 %v2083_v61  ;;  %v1055_v61 = vld [vmem:[#allocation6 + $0x30] sm:$0xff] }
 0x2a5   : > { %1990 = vmatpush1.bf16.msra.mxu0 %v1989_v59  ;;  %v1241_v59 = vld [vmem:[#allocation6 + $0x600] sm:$0xff] }
 0x2a6   : > { %1992 = vmatprep.subr.bf16.mxu0 %v1991_v60  ;;  %v1249_v60 = vld [vmem:[#allocation6 + $0x640] sm:$0xff] }
 0x2a7   : > { %v2021_v62 = vpack.c.bf16 %v1249_v60, %v1241_v59  ;;  %v1053_v59 = vld [vmem:[#allocation6 + $0x20] sm:$0xff] }
 0x2a8   : > { %v1061_v60 = vld [vmem:[#allocation6 + $0x60] sm:$0xff] }
 0x2a9   : > { %1994 = vmatpush1.bf16.msra.mxu0 %v1993_v1  ;;  %v2085_v1 = vpack.c.bf16 %v1251_v0, %v1243_v63  ;;  %v1070_v63 = vld [vmem:[#allocation6 + $0xa8] sm:$0xff] }
 0x2aa   : > { %1996 = vmatprep.subr.bf16.mxu0 %v1995_v2  ;;  %v1258_v2 = vld [vmem:[#allocation6 + $0x688] sm:$0xff] }
 0x2ab   : > { %2086 = vmatpush1.bf16.msra.mxu1 %v2085_v1  ;;  %v2023_v38 = vpack.c.bf16 %v1266_v3, %v1258_v2  ;;  %v1078_v0 = vld [vmem:[#allocation6 + $0xe8] sm:$0xff]  ;;  %v1072_v1 = vld [vmem:[#allocation6 + $0xb8] sm:$0xff]  ;;  %v2101_v3 = vpack.c.bf16 %v1061_v60, %v1053_v59  ;;  %v1135_v60 = vld [vmem:[#allocation6 + $0x2b0] sm:$0xff] }
 0x2ac   : > { %2088 = vmatprep.subr.bf16.mxu1 %v2087_v8  ;;  %v1080_v2 = vld [vmem:[#allocation6 + $0xf8] sm:$0xff]  ;;  %v1079_v8 = vld [vmem:[#allocation6 + $0xf0] sm:$0xff] }
 0x2ad   : > { %1998 = vmatpush1.bf16.msra.mxu0 %v1997_v6  ;;  %v1257_v6 = vld [vmem:[#allocation6 + $0x680] sm:$0xff] }
 0x2ae   : > { %2000 = vmatprep.subr.bf16.mxu0 %v1999_v7  ;;  %v1265_v7 = vld [vmem:[#allocation6 + $0x6c0] sm:$0xff] }
 0x2af   : > { %v2025_v9 = vpack.c.bf16 %v1265_v7, %v1257_v6  ;;  %v1071_v7 = vld [vmem:[#allocation6 + $0xb0] sm:$0xff] }
 0x2b1   : > { %2002 = vmatpush1.bf16.msra.mxu0 %v2001_v12  ;;  %v2089_v12 = vpack.c.bf16 %v1267_v11, %v1259_v10  ;;  %v2103_v11 = vpack.c.bf16 %v1078_v0, %v1070_v63  ;;  %v1158_v63 = vld [vmem:[#allocation6 + $0x368] sm:$0xff]  ;;  %v1152_v0 = vld [vmem:[#allocation6 + $0x338] sm:$0xff] }
 0x2b2   : > { %2004 = vmatprep.subr.bf16.mxu0 %v2003_v13  ;;  %v1274_v13 = vld [vmem:[#allocation6 + $0x708] sm:$0xff] }
 0x2b3   : > { %2090 = vmatpush1.bf16.msra.mxu1 %v2089_v12  ;;  %v2167_v12 = vpack.c.bf16 %v1080_v2, %v1072_v1  ;;  %v1160_v1 = vld [vmem:[#allocation6 + $0x378] sm:$0xff] }
 0x2b5   : > { %2006 = vmatpush1.bf16.msra.mxu0 %v2005_v16  ;;  %v2027_v16 = vpack.c.bf16 %v1282_v14, %v1274_v13  ;;  %v1094_v13 = vld [vmem:[#allocation6 + $0x168] sm:$0xff]  ;;  %v1088_v14 = vld [vmem:[#allocation6 + $0x138] sm:$0xff] }
 0x2b6   : > { %2008 = vmatprep.subr.bf16.mxu0 %v2007_v20  ;;  %v2091_v20 = vpack.c.bf16 %v1284_v17, %v1276_v15  ;;  %v1096_v15 = vld [vmem:[#allocation6 + $0x178] sm:$0xff]  ;;  %v2169_v17 = vpack.c.bf16 %v1079_v8, %v1071_v7  ;;  %v1151_v7 = vld [vmem:[#allocation6 + $0x330] sm:$0xff] }
 0x2b7   : > { %v1159_v8 = vld [vmem:[#allocation6 + $0x370] sm:$0xff] }
 0x2b8   : > { %2092 = vmatprep.subr.bf16.mxu1 %v2091_v20 }
 0x2b9   : > { %2010 = vmatpush1.bf16.msra.mxu0 %v2009_v25  ;;  %v2093_v25 = vpack.c.bf16 %v1283_v23, %v1275_v22  ;;  %v1087_v22 = vld [vmem:[#allocation6 + $0x130] sm:$0xff] }
 0x2ba   : > { %2012 = vmatprep.subr.bf16.mxu0 %v2011_v32  ;;  %v1297_v32 = vld [vmem:[#allocation6 + $0x7c0] sm:$0xff]  ;;  %v1095_v23 = vld [vmem:[#allocation6 + $0x170] sm:$0xff] }
 0x2bb   : > { %2094 = vmatpush1.bf16.msra.mxu1 %v2093_v25  ;;  %v2033_v34 = vpack.c.bf16 %v1297_v32, %v1289_v31  ;;  %v1110_v25 = vld [vmem:[#allocation6 + $0x1e8] sm:$0xff]  ;;  %v1109_v31 = vld [vmem:[#allocation6 + $0x1e0] sm:$0xff] }
 0x2bc   : > { %2096 = vmatprep.subr.bf16.mxu1 %v2095_v30  ;;  %v1101_v30 = vld [vmem:[#allocation6 + $0x1a0] sm:$0xff]  ;;  %v2111_v32 = vpack.c.bf16 %v1110_v25, %v1102_v24  ;;  %v1184_v24 = vld [vmem:[#allocation6 + $0x438] sm:$0xff] }
 0x2bd   : > { %2014 = vmatpush1.bf16.msra.mxu0 %v2013_v37  ;;  %v1054_v37 = vld [vmem:[#allocation6 + $0x28] sm:$0xff]  ;;  %v1192_v25 = vld [vmem:[#allocation6 + $0x478] sm:$0xff] }
 0x2be   : > { %2016 = vmatprep.subr.bf16.mxu0 %v2015_v45  ;;  %v2099_v41 = vpack.c.bf16 %v1062_v39, %v1054_v37  ;;  %v2955_v45 = vshrl.u32 %v959_v44, 7  ;;  %v1126_v37 = vld [vmem:[#allocation6 + $0x268] sm:$0xff]  ;;  %v1120_v39 = vld [vmem:[#allocation6 + $0x238] sm:$0xff]  ;;  %v1125_v44 = vld [vmem:[#allocation6 + $0x260] sm:$0xff] }
 0x2bf   : > { %2098 = vmatpush1.bf16.msra.mxu1 %v2097_v36  ;;  %v1118_v36 = vld [vmem:[#allocation6 + $0x228] sm:$0xff] }
 0x2c0   : > { %2164 = vmatprep.subr.bf16.mxu1 %v2163_v43  ;;  %v961_v46 = vsub.s32 0, %v2955_v45  ;;  %v1117_v43 = vld [vmem:[#allocation6 + $0x220] sm:$0xff] }
 0x2c1   : > { %2018 = vmatpush1.bf16.msra.mxu0 %v2017_v50 }
 0x2c2   : > { %2020 = vmatprep.subr.bf16.mxu0 %v2019_v57  ;;  %v962_v48 = vrot.slane %v957_v47, %v961_v46  ;;  %v2115_v46 = vpack.c.bf16 %v1126_v37, %v1118_v36  ;;  %v2179_v47 = vpack.c.bf16 %v1128_v40, %v1120_v39  ;;  %v1200_v36 = vld [vmem:[#allocation6 + $0x4b8] sm:$0xff] }
 0x2c3   : > { %v1208_v37 = vld [vmem:[#allocation6 + $0x4f8] sm:$0xff] }
 0x2c5   : > { %2022 = vmatpush1.bf16.msra.mxu0 %v2021_v62  ;;  %v1063_v62 = vld [vmem:[#allocation6 + $0x70] sm:$0xff] }
 0x2c6   : > { %2024 = vmatprep.subr.bf16.mxu0 %v2023_v38  ;;  %v2165_v4 = vpack.c.bf16 %v1063_v62, %v1055_v61  ;;  %v1069_v38 = vld [vmem:[#allocation6 + $0xa0] sm:$0xff]  ;;  %v1143_v61 = vld [vmem:[#allocation6 + $0x2f0] sm:$0xff]  ;;  %v1150_v62 = vld [vmem:[#allocation6 + $0x328] sm:$0xff] }
 0x2c9   : > { %2026 = vmatpush1.bf16.msra.mxu0 %v2025_v9  ;;  %v1086_v9 = vld [vmem:[#allocation6 + $0x128] sm:$0xff] }
 0x2ca   : > { %2028 = vmatprep.subr.bf16.mxu0 %v2027_v16  ;;  %v2105_v16 = vpack.c.bf16 %v1077_v5, %v1069_v38  ;;  %v2107_v20 = vpack.c.bf16 %v1094_v13, %v1086_v9  ;;  %v1157_v38 = vld [vmem:[#allocation6 + $0x360] sm:$0xff]  ;;  %v2123_v5 = vpack.c.bf16 %v1158_v63, %v1150_v62  ;;  %v1166_v9 = vld [vmem:[#allocation6 + $0x3a8] sm:$0xff]  ;;  %v1176_v13 = vld [vmem:[#allocation6 + $0x3f8] sm:$0xff] }
 0x2cb   : > { %v1232_v62 = vld [vmem:[#allocation6 + $0x5b8] sm:$0xff] }
 0x2cc   : > { %v1240_v63 = vld [vmem:[#allocation6 + $0x5f8] sm:$0xff] }
 0x2cd   : > { %2030 = vmatpush1.bf16.msra.mxu0 %v2029_v21  ;;  %v2171_v21 = vpack.c.bf16 %v1096_v15, %v1088_v14  ;;  %v2189_v15 = vpack.c.bf16 %v1159_v8, %v1151_v7  ;;  %v1246_v7 = vld [vmem:[#allocation6 + $0x628] sm:$0xff] }
 0x2ce   : > { %2032 = vmatprep.subr.bf16.mxu0 %v2031_v29  ;;  %v2173_v29 = vpack.c.bf16 %v1095_v23, %v1087_v22  ;;  %v1182_v22 = vld [vmem:[#allocation6 + $0x428] sm:$0xff] }
 0x2cf   : > { %v1190_v23 = vld [vmem:[#allocation6 + $0x468] sm:$0xff] }
 0x2d0   : > { %v1254_v8 = vld [vmem:[#allocation6 + $0x668] sm:$0xff] }
 0x2d1   : > { %2034 = vmatpush1.bf16.msra.mxu0 %v2033_v34  ;;  %v1103_v34 = vld [vmem:[#allocation6 + $0x1b0] sm:$0xff] }
 0x2d2   : > { %2100 = vmatprep.subr.bf16.mxu0 %v2099_v41  ;;  %v2113_v41 = vpack.c.bf16 %v1109_v31, %v1101_v30  ;;  %v2177_v42 = vpack.c.bf16 %v1111_v35, %v1103_v34  ;;  %v2131_v30 = vpack.c.bf16 %v1190_v23, %v1182_v22  ;;  %v2195_v31 = vpack.c.bf16 %v1192_v25, %v1184_v24  ;;  %v1198_v34 = vld [vmem:[#allocation6 + $0x4a8] sm:$0xff]  ;;  %v1264_v22 = vld [vmem:[#allocation6 + $0x6b8] sm:$0xff] }
 0x2d3   : > { %v1206_v35 = vld [vmem:[#allocation6 + $0x4e8] sm:$0xff]  ;;  %v1272_v23 = vld [vmem:[#allocation6 + $0x6f8] sm:$0xff] }
 0x367   : > { %v1032_v49 = vpop.f32.mrb[16].mxu0 }
 0x368   : > { %v1033_v50 = vadd.f32 %v1032_v49, %v962_v48  ;;  %v1034_v51 = vpop.f32.mrb[17].mxu0  ;;  %v1127_v49 = vld [vmem:[#allocation6 + $0x270] sm:$0xff] }
 0x369   : > { %v1035_v52 = vadd.f32 %v1034_v51, %v962_v48  ;;  %v1119_v48 = vld [vmem:[#allocation6 + $0x230] sm:$0xff]  ;;  %v1142_v51 = vld [vmem:[#allocation6 + $0x2e8] sm:$0xff] }
 0x36a   : > { %v1777_v53 = vmul.f32 -1.442695, %v1033_v50  ;;  %v1134_v50 = vld [vmem:[#allocation6 + $0x2a8] sm:$0xff] }
 0x36b   : > { %v1778_v54 = vmul.f32 -1.442695, %v1035_v52  ;;  %v1136_v52 = vld [vmem:[#allocation6 + $0x2b8] sm:$0xff] }
 0x36c   : > { %2309 = vpow2.f32 %v1777_v53  ;;  %v1144_v53 = vld [vmem:[#allocation6 + $0x2f8] sm:$0xff] }
 0x36d   : > { %2311 = vpow2.f32 %v1778_v54  ;;  %v2117_v54 = vpack.c.bf16 %v1125_v44, %v1117_v43  ;;  %v2183_v59 = vpack.c.bf16 %v1144_v53, %v1136_v52  ;;  %v2135_v43 = vpack.c.bf16 %v1206_v35, %v1198_v34  ;;  %v1280_v34 = vld [vmem:[#allocation6 + $0x738] sm:$0xff] }
 0x36e   : > { %v2199_v44 = vpack.c.bf16 %v1208_v37, %v1200_v36  ;;  %v1288_v35 = vld [vmem:[#allocation6 + $0x778] sm:$0xff] }
 0x376   : > { %v2310_v55 = vpop.eup %2309 }
 0x377   : > { %v2312_v56 = vpop.eup %2311  ;;  %v1043_v57 = vadd.f32 1.0, %v2310_v55  ;;  %v2181_v55 = vpack.c.bf16 %v1127_v49, %v1119_v48  ;;  %v1214_v48 = vld [vmem:[#allocation6 + $0x528] sm:$0xff] }
 0x378   : > { %v1044_v58 = vadd.f32 1.0, %v2312_v56  ;;  %v1133_v56 = vld [vmem:[#allocation6 + $0x2a0] sm:$0xff]  ;;  %v1222_v49 = vld [vmem:[#allocation6 + $0x568] sm:$0xff] }
 0x37a   : > { %2313 = vrcp.f32 %v1044_v58  ;;  %v2119_v58 = vpack.c.bf16 %v1142_v51, %v1134_v50  ;;  %v1216_v50 = vld [vmem:[#allocation6 + $0x538] sm:$0xff] }
 0x37b   : > { %2315 = vrcp.f32 %v1043_v57  ;;  %v1141_v57 = vld [vmem:[#allocation6 + $0x2e0] sm:$0xff]  ;;  %v1224_v51 = vld [vmem:[#allocation6 + $0x578] sm:$0xff] }
 0x37c   : > { %v2121_v2 = vpack.c.bf16 %v1141_v57, %v1133_v56  ;;  %v2139_v56 = vpack.c.bf16 %v1222_v49, %v1214_v48  ;;  %v2203_v57 = vpack.c.bf16 %v1224_v51, %v1216_v50  ;;  %v1296_v48 = vld [vmem:[#allocation6 + $0x7b8] sm:$0xff] }
 0x37d   : > { %v1304_v49 = vld [vmem:[#allocation6 + $0x7f8] sm:$0xff] }
 0x384   : > { %v2314_v6 = vpop.eup %2313 }
 0x385   : > { %v2958_v10 = vpop.eup %2315  ;;  %1369 = vmatprep.mubr.f32.mxu0 %v2314_v6  ;;  %1440 = vmatprep.mubr.f32.mxu1 %v2314_v6 }
 0x386   : > { %1370 = vmatmul.mubr.f32.vlgmr.msra.gmra.mrb[18].mxu0 %v2958_v10  ;;  %1441 = vmatmul.mubr.f32.vlgmr.msra.gmra.mrb[16].mxu1 %v2958_v10 }
 0x387   : > { %2102 = vmatpush1.bf16.msra.mxu0 %v2101_v3  ;;  %2166 = vmatpush1.bf16.msra.mxu1 %v2165_v4  ;;  %v2185_v3 = vpack.c.bf16 %v1143_v61, %v1135_v60  ;;  %v1149_v4 = vld [vmem:[#allocation6 + $0x320] sm:$0xff]  ;;  %v1230_v60 = vld [vmem:[#allocation6 + $0x5a8] sm:$0xff] }
 0x388   : > { %1511 = vmatprep.mubr.f32.mxu0 %v2314_v6  ;;  %1582 = vmatprep.mubr.f32.mxu1 %v2314_v6  ;;  %v2187_v6 = vpack.c.bf16 %v1160_v1, %v1152_v0  ;;  %v2125_v14 = vpack.c.bf16 %v1157_v38, %v1149_v4  ;;  %v1238_v61 = vld [vmem:[#allocation6 + $0x5e8] sm:$0xff]  ;;  %v2207_v38 = vpack.c.bf16 %v1240_v63, %v1232_v62 }
 0x389   : > { %2104 = vmatprep.subr.bf16.mxu0 %v2103_v11  ;;  %2168 = vmatprep.subr.bf16.mxu1 %v2167_v12  ;;  %v1174_v11 = vld [vmem:[#allocation6 + $0x3e8] sm:$0xff]  ;;  %v1168_v12 = vld [vmem:[#allocation6 + $0x3b8] sm:$0xff]  ;;  %v2143_v4 = vpack.c.bf16 %v1238_v61, %v1230_v60  ;;  %v2455_v60 = vmov 1966171168  }
 0x38a   : > { %v2127_v18 = vpack.c.bf16 %v1174_v11, %v1166_v9  ;;  %v2191_v19 = vpack.c.bf16 %v1176_v13, %v1168_v12  ;;  %v1248_v9 = vld [vmem:[#allocation6 + $0x638] sm:$0xff]  ;;  %v1602_v61 = vunpack.c.l.s4 %v2455_v60 }
 0x38b   : > { %2106 = vmatpush1.bf16.msra.mxu0 %v2105_v16  ;;  %2170 = vmatpush1.bf16.msra.mxu1 %v2169_v17  ;;  %v1165_v16 = vld [vmem:[#allocation6 + $0x3a0] sm:$0xff]  ;;  %v1256_v11 = vld [vmem:[#allocation6 + $0x678] sm:$0xff] }
 0x38c   : > { %2108 = vmatprep.subr.bf16.mxu0 %v2107_v20  ;;  %2172 = vmatprep.subr.bf16.mxu1 %v2171_v21  ;;  %v1173_v17 = vld [vmem:[#allocation6 + $0x3e0] sm:$0xff]  ;;  %v1167_v20 = vld [vmem:[#allocation6 + $0x3b0] sm:$0xff]  ;;  %v1603_v62 = vunpack.c.0.s8 %v1602_v61 }
 0x38d   : > { %v1175_v21 = vld [vmem:[#allocation6 + $0x3f0] sm:$0xff]  ;;  %v2129_v26 = vpack.c.bf16 %v1173_v17, %v1165_v16  ;;  %v2147_v16 = vpack.c.bf16 %v1254_v8, %v1246_v7  ;;  %v2211_v17 = vpack.c.bf16 %v1256_v11, %v1248_v9 }
 0x38e   : > { %v2193_v27 = vpack.c.bf16 %v1175_v21, %v1167_v20  ;;  %v1262_v20 = vld [vmem:[#allocation6 + $0x6a8] sm:$0xff]  ;;  %v1606_v63 = vsub.s32 %v1603_v62, %v2955_v45 }
 0x38f   : > { %2110 = vmatpush1.bf16.msra.mxu0 %v2109_v28  ;;  %2174 = vmatpush1.bf16.msra.mxu1 %v2173_v29  ;;  %v1181_v28 = vld [vmem:[#allocation6 + $0x420] sm:$0xff]  ;;  %v1270_v21 = vld [vmem:[#allocation6 + $0x6e8] sm:$0xff] }
 0x390   : > { %2112 = vmatprep.subr.bf16.mxu0 %v2111_v32  ;;  %2176 = vmatprep.subr.bf16.mxu1 %v2175_v33  ;;  %v1189_v29 = vld [vmem:[#allocation6 + $0x460] sm:$0xff]  ;;  %v1183_v32 = vld [vmem:[#allocation6 + $0x430] sm:$0xff] }
 0x391   : > { %v1191_v33 = vld [vmem:[#allocation6 + $0x470] sm:$0xff]  ;;  %v2133_v39 = vpack.c.bf16 %v1189_v29, %v1181_v28  ;;  %v2151_v28 = vpack.c.bf16 %v1270_v21, %v1262_v20  ;;  %v2215_v29 = vpack.c.bf16 %v1272_v23, %v1264_v22 }
 0x392   : > { %v2197_v40 = vpack.c.bf16 %v1191_v33, %v1183_v32  ;;  %v1278_v32 = vld [vmem:[#allocation6 + $0x728] sm:$0xff] }
 0x393   : > { %2114 = vmatpush1.bf16.msra.mxu0 %v2113_v41  ;;  %2178 = vmatpush1.bf16.msra.mxu1 %v2177_v42  ;;  %v1197_v41 = vld [vmem:[#allocation6 + $0x4a0] sm:$0xff]  ;;  %v1286_v33 = vld [vmem:[#allocation6 + $0x768] sm:$0xff] }
 0x394   : > { %2116 = vmatprep.subr.bf16.mxu0 %v2115_v46  ;;  %2180 = vmatprep.subr.bf16.mxu1 %v2179_v47  ;;  %v1205_v42 = vld [vmem:[#allocation6 + $0x4e0] sm:$0xff]  ;;  %v1199_v46 = vld [vmem:[#allocation6 + $0x4b0] sm:$0xff] }
 0x395   : > { %v1207_v47 = vld [vmem:[#allocation6 + $0x4f0] sm:$0xff]  ;;  %v2137_v52 = vpack.c.bf16 %v1205_v42, %v1197_v41  ;;  %v2155_v41 = vpack.c.bf16 %v1286_v33, %v1278_v32  ;;  %v2219_v42 = vpack.c.bf16 %v1288_v35, %v1280_v34 }
 0x396   : > { %v2201_v53 = vpack.c.bf16 %v1207_v47, %v1199_v46  ;;  %v1294_v46 = vld [vmem:[#allocation6 + $0x7a8] sm:$0xff] }
 0x397   : > { %2118 = vmatpush1.bf16.msra.mxu0 %v2117_v54  ;;  %2182 = vmatpush1.bf16.msra.mxu1 %v2181_v55  ;;  %v1213_v54 = vld [vmem:[#allocation6 + $0x520] sm:$0xff]  ;;  %v1302_v47 = vld [vmem:[#allocation6 + $0x7e8] sm:$0xff] }
 0x398   : > { %2120 = vmatprep.subr.bf16.mxu0 %v2119_v58  ;;  %2184 = vmatprep.subr.bf16.mxu1 %v2183_v59  ;;  %v1221_v55 = vld [vmem:[#allocation6 + $0x560] sm:$0xff]  ;;  %v1215_v58 = vld [vmem:[#allocation6 + $0x530] sm:$0xff] }
 0x399   : > { %v1223_v59 = vld [vmem:[#allocation6 + $0x570] sm:$0xff]  ;;  %v2141_v0 = vpack.c.bf16 %v1221_v55, %v1213_v54  ;;  %v2223_v54 = vpack.c.bf16 %v1304_v49, %v1296_v48  ;;  %v1301_v55 = vld [vmem:[#allocation6 + $0x7e0] sm:$0xff] }
 0x39a   : > { %v2205_v1 = vpack.c.bf16 %v1223_v59, %v1215_v58 }
 0x39b   : > { %2122 = vmatpush1.bf16.msra.mxu0 %v2121_v2  ;;  %2186 = vmatpush1.bf16.msra.mxu1 %v2185_v3  ;;  %v1229_v2 = vld [vmem:[#allocation6 + $0x5a0] sm:$0xff] }
 0x39c   : > { %2124 = vmatprep.subr.bf16.mxu0 %v2123_v5  ;;  %2188 = vmatprep.subr.bf16.mxu1 %v2187_v6  ;;  %v1237_v3 = vld [vmem:[#allocation6 + $0x5e0] sm:$0xff]  ;;  %v1231_v5 = vld [vmem:[#allocation6 + $0x5b0] sm:$0xff] }
 0x39d   : > { %v1239_v6 = vld [vmem:[#allocation6 + $0x5f0] sm:$0xff]  ;;  %v2145_v12 = vpack.c.bf16 %v1237_v3, %v1229_v2 }
 0x39e   : > { %v2209_v13 = vpack.c.bf16 %v1239_v6, %v1231_v5 }
 0x39f   : > { %2126 = vmatpush1.bf16.msra.mxu0 %v2125_v14  ;;  %2190 = vmatpush1.bf16.msra.mxu1 %v2189_v15  ;;  %v1245_v14 = vld [vmem:[#allocation6 + $0x620] sm:$0xff] }
 0x3a0   : > { %2128 = vmatprep.subr.bf16.mxu0 %v2127_v18  ;;  %2192 = vmatprep.subr.bf16.mxu1 %v2191_v19  ;;  %v1253_v15 = vld [vmem:[#allocation6 + $0x660] sm:$0xff]  ;;  %v1247_v18 = vld [vmem:[#allocation6 + $0x630] sm:$0xff] }
 0x3a1   : > { %v1255_v19 = vld [vmem:[#allocation6 + $0x670] sm:$0xff]  ;;  %v2149_v24 = vpack.c.bf16 %v1253_v15, %v1245_v14 }
 0x3a2   : > { %v2213_v25 = vpack.c.bf16 %v1255_v19, %v1247_v18 }
 0x3a3   : > { %2130 = vmatpush1.bf16.msra.mxu0 %v2129_v26  ;;  %2194 = vmatpush1.bf16.msra.mxu1 %v2193_v27  ;;  %v1261_v26 = vld [vmem:[#allocation6 + $0x6a0] sm:$0xff] }
 0x3a4   : > { %2132 = vmatprep.subr.bf16.mxu0 %v2131_v30  ;;  %2196 = vmatprep.subr.bf16.mxu1 %v2195_v31  ;;  %v1269_v27 = vld [vmem:[#allocation6 + $0x6e0] sm:$0xff]  ;;  %v1263_v30 = vld [vmem:[#allocation6 + $0x6b0] sm:$0xff] }
 0x3a5   : > { %v1271_v31 = vld [vmem:[#allocation6 + $0x6f0] sm:$0xff]  ;;  %v2153_v36 = vpack.c.bf16 %v1269_v27, %v1261_v26 }
 0x3a6   : > { %v2217_v37 = vpack.c.bf16 %v1271_v31, %v1263_v30 }
 0x3a7   : > { %2134 = vmatpush1.bf16.msra.mxu0 %v2133_v39  ;;  %2198 = vmatpush1.bf16.msra.mxu1 %v2197_v40  ;;  %v1277_v39 = vld [vmem:[#allocation6 + $0x720] sm:$0xff] }
 0x3a8   : > { %2136 = vmatprep.subr.bf16.mxu0 %v2135_v43  ;;  %2200 = vmatprep.subr.bf16.mxu1 %v2199_v44  ;;  %v1285_v40 = vld [vmem:[#allocation6 + $0x760] sm:$0xff]  ;;  %v1279_v43 = vld [vmem:[#allocation6 + $0x730] sm:$0xff] }
 0x3a9   : > { %v1287_v44 = vld [vmem:[#allocation6 + $0x770] sm:$0xff]  ;;  %v2157_v50 = vpack.c.bf16 %v1285_v40, %v1277_v39 }
 0x3aa   : > { %v2221_v51 = vpack.c.bf16 %v1287_v44, %v1279_v43 }
 0x3ab   : > { %2138 = vmatpush1.bf16.msra.mxu0 %v2137_v52  ;;  %2202 = vmatpush1.bf16.msra.mxu1 %v2201_v53  ;;  %v1293_v52 = vld [vmem:[#allocation6 + $0x7a0] sm:$0xff]  ;;  %v2159_v53 = vpack.c.bf16 %v1302_v47, %v1294_v46 }
 0x3ac   : > { %2140 = vmatprep.subr.bf16.mxu0 %v2139_v56  ;;  %2204 = vmatprep.subr.bf16.mxu1 %v2203_v57  ;;  %v1295_v56 = vld [vmem:[#allocation6 + $0x7b0] sm:$0xff]  ;;  %v2161_v58 = vpack.c.bf16 %v1301_v55, %v1293_v52 }
 0x3ad   : > { %v1303_v57 = vld [vmem:[#allocation6 + $0x7f0] sm:$0xff] }
 0x3ae   : > { %v2225_v59 = vpack.c.bf16 %v1303_v57, %v1295_v56 }
 0x3af   : > { %2142 = vmatpush1.bf16.msra.mxu0 %v2141_v0  ;;  %2206 = vmatpush1.bf16.msra.mxu1 %v2205_v1 }
 0x3b0   : > { %2144 = vmatprep.subr.bf16.mxu0 %v2143_v4  ;;  %2208 = vmatprep.subr.bf16.mxu1 %v2207_v38 }
 0x3b3   : > { %2146 = vmatpush1.bf16.msra.mxu0 %v2145_v12  ;;  %2210 = vmatpush1.bf16.msra.mxu1 %v2209_v13 }
 0x3b4   : > { %2148 = vmatprep.subr.bf16.mxu0 %v2147_v16  ;;  %2212 = vmatprep.subr.bf16.mxu1 %v2211_v17 }
 0x3b7   : > { %2150 = vmatpush1.bf16.msra.mxu0 %v2149_v24  ;;  %2214 = vmatpush1.bf16.msra.mxu1 %v2213_v25 }
 0x3b8   : > { %2152 = vmatprep.subr.bf16.mxu0 %v2151_v28  ;;  %2216 = vmatprep.subr.bf16.mxu1 %v2215_v29 }
 0x3bb   : > { %2154 = vmatpush1.bf16.msra.mxu0 %v2153_v36  ;;  %2218 = vmatpush1.bf16.msra.mxu1 %v2217_v37 }
 0x3bc   : > { %2156 = vmatprep.subr.bf16.mxu0 %v2155_v41  ;;  %2220 = vmatprep.subr.bf16.mxu1 %v2219_v42 }
 0x3bf   : > { %2158 = vmatpush1.bf16.msra.mxu0 %v2157_v50  ;;  %2222 = vmatpush1.bf16.msra.mxu1 %v2221_v51 }
 0x3c0   : > { %2160 = vmatprep.subr.bf16.mxu0 %v2159_v53  ;;  %2224 = vmatprep.subr.bf16.mxu1 %v2223_v54 }
 0x3c3   : > { %2162 = vmatpush1.bf16.msra.mxu0 %v2161_v58  ;;  %2226 = vmatpush1.bf16.msra.mxu1 %v2225_v59 }
 0x3c6   : > { %1512 = vmatmul.mubr.f32.vlgmr.msra.gmra.mrb[20].mxu0 %v2958_v10  ;;  %1583 = vmatmul.mubr.f32.vlgmr.msra.gmra.mrb[18].mxu1 %v2958_v10 }
 0x459   : > { %v1371_v0 = vpop.f32.mrb[18].mxu0  ;;  %v1442_v1 = vpop.f32.mrb[16].mxu1 }
 0x45a   : > { %v1373_v2 = vpop.f32.mrb[19].mxu0  ;;  %v1444_v3 = vpop.f32.mrb[17].mxu1 }
 0x45b   : > { %v1597_v4 = vcombine.low %v1371_v0, %v1373_v2  ;;  %v1598_v38 = vcombine.low %v1442_v1, %v1444_v3 }
 0x45d   : > { %v1607_v5 = vrot.slane %v1597_v4, %v1606_v63  ;;  %v1614_v6 = vrot.slane %v1598_v38, %v1606_v63 }
 0x45f   : > { %v1629_v7 = vcombine.low %v1607_v5, %v1614_v6 }
 0x461   : > { %v1637_v8 = vrot.slane %v1629_v7, %v1606_v63 }
 0x499   : > { %v1513_v9 = vpop.f32.mrb[20].mxu0  ;;  %v1584_v11 = vpop.f32.mrb[18].mxu1 }
 0x49a   : > { %v1515_v10 = vpop.f32.mrb[21].mxu0  ;;  %v1586_v12 = vpop.f32.mrb[19].mxu1 }
 0x49b   : > { %v1599_v13 = vcombine.low %v1513_v9, %v1515_v10  ;;  %v1600_v45 = vcombine.low %v1584_v11, %v1586_v12 }
 0x49d   : > { %v1621_v14 = vrot.slane %v1599_v13, %v1606_v63  ;;  %v1628_v15 = vrot.slane %v1600_v45, %v1606_v63 }
 0x49f   : > { %v1630_v16 = vcombine.low %v1621_v14, %v1628_v15 }
 0x4a1   : > { %v1644_v17 = vrot.slane %v1630_v16, %v1606_v63 }
 0x4a3   : > { %v1645_v18 = vcombine.low %v1637_v8, %v1644_v17 }
 0x4a5   : > { %1647 = vst [vmem:[%s382_s26] sm:$0xff] %v1645_v18 }
 0x4a6   : > { %2388 = shalt.err (!%p2385_p9)
}
 0x4a7   : > { %s2389_s15 = scalar_lea.hbm %s2970_s16, 128  ;;  %s2393_s18 = scalar_lea.hbm %s3023_s9, 256 }
 0x4a8   : > { %p2390_p2 = scmp.ne.s32.totalorder %s2970_s16, %s2389_s15  ;;  %p2394_p11 = scmp.lt.u32.totalorder %s2970_s16, %s3023_s9 }
 0x4a9   : > { %p2395_p1 = scmp.lt.u32.totalorder %s2393_s18, %s2389_s15  ;;  %p2397_p6 = scmp.lt.u32.totalorder %s2389_s15, %s2970_s16 }
 0x4aa   : > { %p2391_p0 = pnand %p2390_p2, %p2601_p12 }
 0x4ab   : > { %p2396_p4 = por %p2395_p1, %p2394_p11 }
 0x4ac   : > { %p2392_p5 = pneg %p2391_p0 }
 0x4ad   : > { %p2398_p8 = por %p2397_p6, %p2396_p4 }
 0x4af   : > { %p2399_p10 = pnand %p2398_p8, %p2392_p5 }
 0x4b1   : > { %2402 = shalt.err (!%p2399_p10)
}
 0x4b2   : > { %2249 = dma.vmem_to_hbm [thread:$0]  (%p2601_p12), %s2972_s19, 128, %s2970_s16, %s1649_s22  }
 0x4b3 PF: > { %s1675_s23 = sand.u32 1, %s2433_s11   ;;  %p3041_p13 = scmp.ne.s32.totalorder %s3030_s17, 0 }
 0x4b4   : > { %p3042_p3 = scmp.ge.s32.totalorder %s2445_s14, 2  ;;  %s1676_s24 = scalar_lea.sflag [#allocation5], %s1675_s23 }
 0x4b6   : > { %p2260_p7 = pnand %p3042_p3, %p3041_p13 }
 0x4b8   : > { %2428 = dma.done.wait (!%p2260_p7), %s1676_s24, 128  }
 0x4b9   : > { %2430 = vsyncadd (!%p2260_p7), %s1676_s24, 4294967168  ;;  %s3043_s14 = sld [smem:[#allocation12_spill]]  ;;  %s3044_s11 = smov %s2437_s12 }
 0x4ba   : > { %s3045_s12 = smov %s2441_s13  ;;  %s3046_s13 = smov %s2597_s28 }
 0x4bf   : > { %p25_p9 = scmp.ge.s32.totalorder %s3043_s14, 4  }
 0x4c1   :  { %27 = sbr.rel (!%p25_p9) target bundleno = 9 (0x9), region = 108 }
 0x4c8   :  { %1681 = vsyncpa [#allocation4], 1 }
 0x4c9   :  { %1683 = vsyncpa [#allocation4 + $0x1], 1 }
 0x4ca   :  { %1684 = vsyncpa [#allocation7], 1 }
 0x4cb   :  { %1685 = vsyncpa [#allocation5], 1 }
 0x4cc   :  { %1687 = vsyncpa [#allocation5 + $0x1], 1 }

</bundles_post_ra>
